<compile_context>
chip_gen: v7x
topology: tpu7x:2x2x1
jax: 0.10.0
libtpu: 0.0.40
codegen_flags: <defaults>
</compile_context>

<pallas_src>
import math
import jax
import jax.numpy as jnp
from jax import lax
from jax.experimental import pallas as pl
from jax.experimental.pallas import tpu as pltpu

EPS = 1e-8


# ----------------------------- Pallas kernel --------------------------------
def _cct2d_kernel(pr_ref, pi_ref, w_ref, mb_ref, pb_ref, m_ref, phi_ref):
    pr = pr_ref[...]                                   # (K, tile_m) f32
    pi = pi_ref[...]                                   # (K, tile_m) f32
    # |x| patches computed in-kernel (no third DMA stream).
    pa = jnp.sqrt(pr * pr + pi * pi)

    w = w_ref[...]                                     # (C_out, K) f32
    psi_r = jnp.dot(w, pr, preferred_element_type=jnp.float32)   # (C_out, tile_m)
    psi_i = jnp.dot(w, pi, preferred_element_type=jnp.float32)
    chi   = jnp.dot(w, pa, preferred_element_type=jnp.float32)

    mb = mb_ref[...]                                   # (C_out, 1) -> broadcast over lanes
    pb = pb_ref[...]

    m_psi_raw = jnp.sqrt(psi_r * psi_r + psi_i * psi_i)
    # stable_angle: clamp tiny imaginary parts to +eps before angle()
    imag_safe = jnp.where((psi_i < EPS) & (psi_i > -EPS), EPS, psi_i)

    # m = 0.5*(|psi| + mb) + 0.5*(chi + mb) == 0.5*(|psi| + chi) + mb
    m_ref[...]   = 0.5 * (m_psi_raw + chi) + mb
    phi_ref[...] = jnp.arctan2(imag_safe, psi_r) + pb


# ----------------------------- glue (plain JAX) ------------------------------
def _im2col_conv_transpose_T(x, kH, kW, stride, padding, output_padding):
    """Dilate + pad so ConvTranspose2d becomes a stride-1 conv, then extract
    (kH*kW) patches.  x: (N, C, H, W) -> (C*kH*kW, N*H_out*W_out)  [K, M]."""
    N, C, H, W = x.shape
    Hd = (H - 1) * stride + 1
    Wd = (W - 1) * stride + 1
    xd = jnp.zeros((N, C, Hd, Wd), x.dtype).at[:, :, ::stride, ::stride].set(x)
    ph = kH - 1 - padding
    pw = kW - 1 - padding
    xp = jnp.pad(xd, ((0, 0), (0, 0), (ph, ph + output_padding), (pw, pw + output_padding)))
    H_out = (H - 1) * stride - 2 * padding + kH + output_padding
    W_out = (W - 1) * stride - 2 * padding + kW + output_padding
    cols = []
    for i in range(kH):
        for j in range(kW):
            cols.append(xp[:, :, i:i + H_out, j:j + W_out])
    p = jnp.stack(cols, axis=2)                        # (N, C, kH*kW, H_out, W_out)
    p = jnp.transpose(p, (1, 2, 0, 3, 4))              # (C, kH*kW, N, H_out, W_out)
    p = p.reshape(C * kH * kW, N * H_out * W_out)      # (K, M) with K ordered (ci, i, j)
    return p, H_out, W_out


def _pick_tile_m(M, max_tile=2048):
    """Largest lane-aligned tile <= max_tile that still leaves >= 2 grid steps
    (so the parallel axis can be split across v7x's two TensorCores)."""
    half = pl.cdiv(M, 2)
    half_aligned = ((half + 127) // 128) * 128
    return max(128, min(max_tile, half_aligned))


def complex_conv_transpose2d(x_real, x_imag, weight, magnitude_bias, phase_bias,
                             stride=1, padding=0, output_padding=0, tile_m=None):
    """Forward of ComplexConvTranspose2d. Returns (m, phi), each (N, C_out, H_out, W_out)."""
    N, C_in, H, W = x_real.shape
    C_in_w, C_out, kH, kW = weight.shape
    assert C_in_w == C_in

    # Only two im2col streams (real, imag); |x| patches are built in-kernel.
    pr, H_out, W_out = _im2col_conv_transpose_T(x_real, kH, kW, stride, padding, output_padding)
    pi, _, _ = _im2col_conv_transpose_T(x_imag, kH, kW, stride, padding, output_padding)

    M = N * H_out * W_out
    K = C_in * kH * kW
    if tile_m is None:
        tile_m = _pick_tile_m(M)
    M_pad = pl.cdiv(M, tile_m) * tile_m
    pad_cols = lambda p: jnp.pad(p, ((0, 0), (0, M_pad - M)))
    pr, pi = pad_cols(pr).astype(jnp.float32), pad_cols(pi).astype(jnp.float32)

    # ConvTranspose2d weight is (C_in, C_out, kH, kW); flip spatially and flatten
    # to (C_out, K) with K ordered as (ci, i, j) to match the patch layout above.
    w_mat = jnp.transpose(weight[:, :, ::-1, ::-1], (1, 0, 2, 3)).reshape(C_out, K)
    w_mat = w_mat.astype(jnp.float32)
    mb = magnitude_bias.reshape(C_out, 1).astype(jnp.float32)
    pb = phase_bias.reshape(C_out, 1).astype(jnp.float32)

    grid = (M_pad // tile_m,)
    patch_spec = pl.BlockSpec((K, tile_m), lambda i: (0, i))
    w_spec     = pl.BlockSpec((C_out, K), lambda i: (0, 0))      # resident across steps
    bias_spec  = pl.BlockSpec((C_out, 1), lambda i: (0, 0))
    out_spec   = pl.BlockSpec((C_out, tile_m), lambda i: (0, i))

    cost = pl.CostEstimate(
        flops=3 * 2 * M_pad * K * C_out,
        transcendentals=M_pad * K + 2 * M_pad * C_out,           # in-kernel abs + sqrt/atan2
        bytes_accessed=4 * (2 * K * M_pad + K * C_out + 2 * C_out + 2 * C_out * M_pad),
    )

    m_t, phi_t = pl.pallas_call(
        _cct2d_kernel,
        out_shape=(jax.ShapeDtypeStruct((C_out, M_pad), jnp.float32),
                   jax.ShapeDtypeStruct((C_out, M_pad), jnp.float32)),
        grid=grid,
        in_specs=[patch_spec, patch_spec, w_spec, bias_spec, bias_spec],
        out_specs=(out_spec, out_spec),
        compiler_params=pltpu.CompilerParams(
            dimension_semantics=("parallel",),
            vmem_limit_bytes=64 * 1024 * 1024),
        cost_estimate=cost,
    )(pr, pi, w_mat, mb, pb)

    def to_nchw(z):
        z = z[:, :M].reshape(C_out, N, H_out, W_out)
        return jnp.transpose(z, (1, 0, 2, 3))

    return to_nchw(m_t), to_nchw(phi_t)


# ----------------------------- pure-JAX reference ----------------------------
def _ref_forward(x_real, x_imag, weight, magnitude_bias, phase_bias,
                 stride, padding, output_padding):
    kH, kW = weight.shape[2], weight.shape[3]
    w_oihw = jnp.transpose(weight[:, :, ::-1, ::-1], (1, 0, 2, 3))

    def conv_t(x):
        return lax.conv_general_dilated(
            x, w_oihw, window_strides=(1, 1),
            padding=[(kH - 1 - padding, kH - 1 - padding + output_padding),
                     (kW - 1 - padding, kW - 1 - padding + output_padding)],
            lhs_dilation=(stride, stride),
            dimension_numbers=("NCHW", "OIHW", "NCHW"))

    psi_r = conv_t(x_real)
    psi_i = conv_t(x_imag)
    chi = conv_t(jnp.sqrt(x_real * x_real + x_imag * x_imag))
    m_psi = jnp.sqrt(psi_r * psi_r + psi_i * psi_i) + magnitude_bias
    imag_safe = jnp.where((psi_i < EPS) & (psi_i > -EPS), EPS, psi_i)
    phi = jnp.arctan2(imag_safe, psi_r) + phase_bias
    m = 0.5 * m_psi + 0.5 * (chi + magnitude_bias)
    return m, phi


# ----------------------------- main ------------------------------------------
if __name__ == "__main__":
    # Module config
    in_channels, out_channels = 4, 8
    kernel_size, stride, padding, output_padding = 3, 2, 1, 1
    N, H, W = 2, 16, 16

    key = jax.random.PRNGKey(0)
    k_w, k_b, k_r, k_i = jax.random.split(key, 4)

    # Deterministic parameter init (shapes from the PyTorch module's __init__).
    # conv_tran.weight: (in_channels, out_channels, kH, kW)
    weight = jax.random.normal(k_w, (in_channels, out_channels, kernel_size, kernel_size),
                               dtype=jnp.float32) * 0.1
    fan_in = out_channels * kernel_size * kernel_size
    bound = 1.0 / math.sqrt(fan_in)
    magnitude_bias = jax.random.uniform(k_b, (1, out_channels, 1, 1),
                                        minval=-bound, maxval=bound, dtype=jnp.float32)
    phase_bias = jnp.zeros((1, out_channels, 1, 1), dtype=jnp.float32)

    # Complex input x (NCHW), represented as real/imag float32 arrays.
    x_real = jax.random.normal(k_r, (N, in_channels, H, W), dtype=jnp.float32)
    x_imag = jax.random.normal(k_i, (N, in_channels, H, W), dtype=jnp.float32)

    m, phi = complex_conv_transpose2d(
        x_real, x_imag, weight, magnitude_bias, phase_bias,
        stride=stride, padding=padding, output_padding=output_padding)
    jax.block_until_ready((m, phi))

    # Correctness check against a pure-JAX reference.
    m_ref, phi_ref = _ref_forward(x_real, x_imag, weight, magnitude_bias, phase_bias,
                                  stride, padding, output_padding)
    assert m.shape == m_ref.shape and phi.shape == phi_ref.shape
    assert jnp.allclose(m, m_ref, atol=1e-4, rtol=1e-4), "magnitude mismatch"
    # compare phases modulo 2*pi (robust to branch flips at the +-pi boundary)
    dphi = phi - phi_ref
    dphi_wrapped = jnp.minimum(jnp.abs(dphi), jnp.abs(jnp.abs(dphi) - 2.0 * jnp.pi))
    assert jnp.max(dphi_wrapped) < 1e-3, "phase mismatch"

    print("KERNEL_OK")
</pallas_src>

<mosaic_0001>
module attributes {stable_mosaic.version = 11 : i64} {
  func.func @_cct2d_kernel(%arg0: i32, %arg1: memref<36x1024xf32, #tpu.memory_space<vmem>>, %arg2: memref<36x1024xf32, #tpu.memory_space<vmem>>, %arg3: memref<8x36xf32, #tpu.memory_space<vmem>>, %arg4: memref<8x1xf32, #tpu.memory_space<vmem>>, %arg5: memref<8x1xf32, #tpu.memory_space<vmem>>, %arg6: memref<8x1024xf32, #tpu.memory_space<vmem>>, %arg7: memref<8x1024xf32, #tpu.memory_space<vmem>>) attributes {dimension_semantics = [#tpu.dimension_semantics<parallel>], iteration_bounds = array<i64: 2>, scalar_prefetch = 0 : i64, scratch_operands = 0 : i64, tpu.core_type = #tpu.core_type<tc>, window_params = [{transform_indices = @transform_0, window_bounds = array<i64: 36, 1024>}, {transform_indices = @transform_1, window_bounds = array<i64: 36, 1024>}, {pipeline_mode = #tpu.pipeline_mode<synchronous>, transform_indices = @transform_2, window_bounds = array<i64: 8, 36>}, {pipeline_mode = #tpu.pipeline_mode<synchronous>, transform_indices = @transform_3, window_bounds = array<i64: 8, 1>}, {pipeline_mode = #tpu.pipeline_mode<synchronous>, transform_indices = @transform_4, window_bounds = array<i64: 8, 1>}, {transform_indices = @transform_5, window_bounds = array<i64: 8, 1024>}, {transform_indices = @transform_6, window_bounds = array<i64: 8, 1024>}]} {
    %c0 = arith.constant 0 : index
    %c0_0 = arith.constant 0 : index
    %0 = vector.load %arg1[%c0, %c0_0] : memref<36x1024xf32, #tpu.memory_space<vmem>>, vector<36x1024xf32>
    %c0_1 = arith.constant 0 : index
    %c0_2 = arith.constant 0 : index
    %1 = vector.load %arg2[%c0_1, %c0_2] : memref<36x1024xf32, #tpu.memory_space<vmem>>, vector<36x1024xf32>
    %2 = arith.mulf %0, %0 : vector<36x1024xf32>
    %3 = arith.mulf %1, %1 : vector<36x1024xf32>
    %4 = arith.addf %2, %3 : vector<36x1024xf32>
    %5 = math.sqrt %4 : vector<36x1024xf32>
    %c0_3 = arith.constant 0 : index
    %c0_4 = arith.constant 0 : index
    %6 = vector.load %arg3[%c0_3, %c0_4] : memref<8x36xf32, #tpu.memory_space<vmem>>, vector<8x36xf32>
    %cst = arith.constant dense<0.000000e+00> : vector<8x1024xf32>
    %7 = tpu.matmul %6, %0, %cst {dimension_numbers = #tpu.dot_dimension_numbers<[1], [0], [0], [1], [0, 0, 1, 1], [], []>} : vector<8x36xf32>, vector<36x1024xf32>, vector<8x1024xf32> -> vector<8x1024xf32>
    %cst_5 = arith.constant dense<0.000000e+00> : vector<8x1024xf32>
    %8 = tpu.matmul %6, %1, %cst_5 {dimension_numbers = #tpu.dot_dimension_numbers<[1], [0], [0], [1], [0, 0, 1, 1], [], []>} : vector<8x36xf32>, vector<36x1024xf32>, vector<8x1024xf32> -> vector<8x1024xf32>
    %cst_6 = arith.constant dense<0.000000e+00> : vector<8x1024xf32>
    %9 = tpu.matmul %6, %5, %cst_6 {dimension_numbers = #tpu.dot_dimension_numbers<[1], [0], [0], [1], [0, 0, 1, 1], [], []>} : vector<8x36xf32>, vector<36x1024xf32>, vector<8x1024xf32> -> vector<8x1024xf32>
    %c0_7 = arith.constant 0 : index
    %c0_8 = arith.constant 0 : index
    %10 = vector.load %arg4[%c0_7, %c0_8] : memref<8x1xf32, #tpu.memory_space<vmem>>, vector<8x1xf32>
    %c0_9 = arith.constant 0 : index
    %c0_10 = arith.constant 0 : index
    %11 = vector.load %arg5[%c0_9, %c0_10] : memref<8x1xf32, #tpu.memory_space<vmem>>, vector<8x1xf32>
    %12 = arith.mulf %7, %7 : vector<8x1024xf32>
    %13 = arith.mulf %8, %8 : vector<8x1024xf32>
    %14 = arith.addf %12, %13 : vector<8x1024xf32>
    %15 = math.sqrt %14 : vector<8x1024xf32>
    %cst_11 = arith.constant 9.99999993E-9 : f32
    %16 = vector.broadcast %cst_11 : f32 to vector<8x1024xf32>
    %17 = arith.cmpf olt, %8, %16 : vector<8x1024xf32>
    %cst_12 = arith.constant -9.99999993E-9 : f32
    %18 = vector.broadcast %cst_12 : f32 to vector<8x1024xf32>
    %19 = arith.cmpf ogt, %8, %18 : vector<8x1024xf32>
    %20 = arith.andi %17, %19 : vector<8x1024xi1>
    %cst_13 = arith.constant 9.99999993E-9 : f32
    %21 = vector.broadcast %cst_13 : f32 to vector<8x1024xf32>
    %22 = arith.select %20, %21, %8 : vector<8x1024xi1>, vector<8x1024xf32>
    %23 = arith.addf %15, %9 : vector<8x1024xf32>
    %cst_14 = arith.constant 5.000000e-01 : f32
    %24 = vector.broadcast %cst_14 : f32 to vector<8x1024xf32>
    %25 = arith.mulf %24, %23 : vector<8x1024xf32>
    %26 = vector.broadcast %10 : vector<8x1xf32> to vector<8x1024xf32>
    %27 = arith.addf %25, %26 : vector<8x1024xf32>
    %c0_15 = arith.constant 0 : index
    %c0_16 = arith.constant 0 : index
    %28 = vector.load %arg6[%c0_15, %c0_16] : memref<8x1024xf32, #tpu.memory_space<vmem>>, vector<8x1024xf32>
    tpu.vector_store %arg6[%c0_15, %c0_16], %27 {strides = array<i32>} : memref<8x1024xf32, #tpu.memory_space<vmem>>, vector<8x1024xf32>,
    %29 = math.atan2 %22, %7 : vector<8x1024xf32>
    %30 = vector.broadcast %11 : vector<8x1xf32> to vector<8x1024xf32>
    %31 = arith.addf %29, %30 : vector<8x1024xf32>
    %c0_17 = arith.constant 0 : index
    %c0_18 = arith.constant 0 : index
    %32 = vector.load %arg7[%c0_17, %c0_18] : memref<8x1024xf32, #tpu.memory_space<vmem>>, vector<8x1024xf32>
    tpu.vector_store %arg7[%c0_17, %c0_18], %31 {strides = array<i32>} : memref<8x1024xf32, #tpu.memory_space<vmem>>, vector<8x1024xf32>,
    return
  }
  func.func @transform_0(%arg0: i32) -> (i32, i32) {
    %c0_i32 = arith.constant 0 : i32
    %c0_i32_0 = arith.constant 0 : i32
    return %c0_i32, %arg0 : i32, i32
  }
  func.func @transform_1(%arg0: i32) -> (i32, i32) {
    %c0_i32 = arith.constant 0 : i32
    %c0_i32_0 = arith.constant 0 : i32
    return %c0_i32, %arg0 : i32, i32
  }
  func.func @transform_2(%arg0: i32) -> (i32, i32) {
    %c0_i32 = arith.constant 0 : i32
    %c0_i32_0 = arith.constant 0 : i32
    %c0_i32_1 = arith.constant 0 : i32
    return %c0_i32, %c0_i32_0 : i32, i32
  }
  func.func @transform_3(%arg0: i32) -> (i32, i32) {
    %c0_i32 = arith.constant 0 : i32
    %c0_i32_0 = arith.constant 0 : i32
    %c0_i32_1 = arith.constant 0 : i32
    return %c0_i32, %c0_i32_0 : i32, i32
  }
  func.func @transform_4(%arg0: i32) -> (i32, i32) {
    %c0_i32 = arith.constant 0 : i32
    %c0_i32_0 = arith.constant 0 : i32
    %c0_i32_1 = arith.constant 0 : i32
    return %c0_i32, %c0_i32_0 : i32, i32
  }
  func.func @transform_5(%arg0: i32) -> (i32, i32) {
    %c0_i32 = arith.constant 0 : i32
    %c0_i32_0 = arith.constant 0 : i32
    return %c0_i32, %arg0 : i32, i32
  }
  func.func @transform_6(%arg0: i32) -> (i32, i32) {
    %c0_i32 = arith.constant 0 : i32
    %c0_i32_0 = arith.constant 0 : i32
    return %c0_i32, %arg0 : i32, i32
  }
}

</mosaic_0001>

<bundles_post_ra>
// kernel: tpu_custom_call.1
= control target key start
LH: loop header
LB: loop body
LE: loop exit
PB: predicated region body
PF: predicated region fallthrough
CT: control target
= control target key end

     0   :  { %s5268_s0 = inlined_call_operand.hbm [shape: f32[36,2048], index: 0, kind: input, shape index: {}]   ;;  %s5269_s1 = inlined_call_operand.hbm [shape: f32[36,2048], index: 1, kind: input, shape index: {}]   ;;  %s5270_s2 = inlined_call_operand.hbm [shape: f32[8,36], index: 2, kind: input, shape index: {}]   ;;  %s5271_s3 = inlined_call_operand.hbm [shape: f32[8,1], index: 3, kind: input, shape index: {}]   ;;  %s5272_s4 = inlined_call_operand.hbm [shape: f32[8,1], index: 4, kind: input, shape index: {}]   ;;  %s5273_s5 = inlined_call_operand.hbm [shape: f32[8,2048], index: 5, kind: output, shape index: {0}]   ;;  %s5274_s6 = inlined_call_operand.hbm [shape: f32[8,2048], index: 6, kind: output, shape index: {1}]  }
   0x1   :  { %5339 = sst [smem:[#allocation64_spill]] %s5268_s0 }
   0x2   :  { %5340 = sst [smem:[#allocation65_spill]] %s5270_s2 }
   0x3   :  { %5341 = sst [smem:[#allocation66_spill]] %s5271_s3 }
   0x4   :  { %12 = vsyncpa [#allocation3], 0 }
   0x5   :  { %14 = vsyncpa [#allocation3 + $0x1], 0 }
   0x6   :  { %15 = vsyncpa [#allocation6], 0 }
   0x7   :  { %17 = vsyncpa [#allocation6 + $0x1], 0 }
   0x8   :  { %18 = vsyncpa [#allocation9], 0 }
   0x9   :  { %19 = vsyncpa [#allocation4], 0 }
   0xa   :  { %21 = vsyncpa [#allocation4 + $0x1], 0 }
   0xb   :  { %22 = vsyncpa [#allocation13], 0 }
   0xc   :  { %24 = vsyncpa [#allocation13 + $0x1], 0  ;;  %s3181_s21 = smov 0   ;;  %s3183_s22 = smov 0  }
   0xd   :  { %s3185_s23 = smov 0   ;;  %s3187_s24 = smov 0  }
   0xe LB: > { %s3202_s25 = sadd.s32 4294967295, %s3131_s24   ;;  %s2507_s26 = sadd.s32 4294967294, %s3131_s24   ;;  %s3131_s24 = sphi %s3187_s24, %s5557_s24   ;;  %s3127_s23 = sphi %s3185_s23, %s5556_s23   ;;  %s3123_s22 = sphi %s3183_s22, %s5555_s22   ;;  %s3119_s21 = sphi %s3181_s21, %s5554_s21  }
   0xf   : > { %s3206_s27 = sadd.s32 1, %s3131_s24   ;;  %s37_s28 = sadd.s32 1, %s3127_s23 }
  0x10   : > { %s34_s29 = ssub.s32 %s3131_s24, %s3206_s27  ;;  %p44_p0 = scmp.ne.s32.totalorder %s3127_s23, %s3123_s22 }
  0x11   : > { %p35_p1 = scmp.eq.s32.totalorder %s34_s29, 0  ;;  %p45_p2 = scmp.eq.s32.totalorder %s3131_s24, 0 }
  0x12   : > { %p50_p3 = scmp.ne.s32.totalorder %s3123_s22, %s3119_s21  ;;  %p5275_p4 = scmp.eq.s32.totalorder %s3202_s25, 0 }
  0x13   : > { %s3218_s30 = scalar_select %p35_p1, %s3127_s23, %s37_s28  }
  0x14   : > { %p3220_p5 = por %p45_p2, %p44_p0  ;;  %p3226_p6 = por %p5275_p4, %p50_p3 }
  0x15   : > { %5342 = sst [smem:[#allocation20_spill]] %s3218_s30  ;;  %p163_p7 = scmp.eq.s32.totalorder %s3202_s25, 1 }
  0x16   : > { %s5344_s8 = scalar_select %p3226_p6, 1, 0 }
  0x17   : > { %p169_p8 = scmp.eq.s32.totalorder %s2507_s26, 1  ;;  %p2508_p9 = scmp.ge.s32.totalorder %s3131_s24, 1 }
  0x18   : > { %p202_p10 = scmp.lt.s32.totalorder %s3131_s24, 3  ;;  %p3233_p11 = por %p163_p7, %p44_p0 }
  0x19   : > { %p3237_p12 = por %p169_p8, %p50_p3  ;;  %s3133_s12 = smov [#allocation7]  }
  0x1a   : > { %s5345_s9 = scalar_select %p3233_p11, 1, 0 }
  0x1b   : > { %s5346_s10 = scalar_select %p3237_p12, 1, 0 }
  0x1c   : > { %p3241_p13 = pnand %p2508_p9, %p202_p10  ;;  %s215_s13 = sshll.u32 %s3133_s12, 4  ;;  %s216_s13 = int_to_ptr.vmem [resolvable:$true] %s215_s13 }
  0x1d   : > { %p2717_p4 = scmp.lt.s32.totalorder %s3131_s24, 2  ;;  %p5348_p0 = scmp.eq.s32.totalorder %s3202_s25, 0 }
  0x1e   : > { %s5347_s11 = scalar_select %p3241_p13, 1, 0 }
  0x1f   : > { %p2690_p2 = pneg %p3241_p13  ;;  %p3257_p3 = pnand %p2717_p4, %p3220_p5 }
  0x20   : > { %s3134_s16 = smov [#allocation8]   ;;  %s5351_s2 = sld [smem:[#allocation65_spill]] }
  0x21   : > { %p3251_p7 = pnand %p2690_p2, %p5348_p0  ;;  %s226_s17 = sshll.u32 %s3134_s16, 4  ;;  %s3261_s17 = int_to_ptr.vmem [resolvable:$true] %s226_s17 }
  0x22   : > { %s5350_s15 = scalar_select %p3257_p3, 1, 0 }
  0x23   : > { %p3271_p9 = pneg %p3251_p7 }
  0x26   : > { %s2877_s20 = scalar_lea.hbm %s5351_s2, 128 }
  0x27   : > { %p2878_p8 = scmp.ne.s32.totalorder %s5351_s2, %s2877_s20  ;;  %p2884_p10 = scmp.lt.u32.totalorder %s2877_s20, %s5351_s2 }
  0x29   : > { %p2880_p4 = pnand %p3271_p9, %p2878_p8 }
  0x2b   : > { %p2881_p5 = pneg %p2880_p4 }
  0x2d   : > { %p2886_p2 = pnand %p2884_p10, %p2881_p5 }
  0x2f   : > { %2889 = shalt.err (!%p2886_p2)
}
  0x30   : > { %s2890_s16 = scalar_lea.vmem %s216_s13, 128  ;;  %p2898_p11 = scmp.lt.s32.totalorder %s216_s13, %s216_s13 }
  0x31   : > { %p2891_p0 = scmp.ne.s32.totalorder %s216_s13, %s2890_s16  ;;  %p2899_p6 = scmp.lt.s32.totalorder %s2890_s16, %s2890_s16 }
  0x33   : > { %p2893_p1 = pnand %p2891_p0, %p3271_p9  ;;  %p2900_p13 = por %p2899_p6, %p2898_p11 }
  0x35   : > { %p2894_p12 = pneg %p2893_p1 }
  0x37   : > { %p2901_p3 = pnand %p2900_p13, %p2894_p12 }
  0x39   : > { %2904 = shalt.err (!%p2901_p3)
}
  0x3a   : > { %2693 = dma.hbm_to_vmem [thread:$0]  (!%p3251_p7), %s5351_s2, 128, %s216_s13, [#allocation6]  }
  0x3b   : > { %s5353_s3 = sld [smem:[#allocation66_spill]] }
  0x41   : > { %s2905_s28 = scalar_lea.hbm %s5353_s3, 128 }
  0x42   : > { %p2906_p1 = scmp.ne.s32.totalorder %s5353_s3, %s2905_s28  ;;  %p2912_p11 = scmp.lt.u32.totalorder %s2905_s28, %s5353_s3 }
  0x44   : > { %p2908_p8 = pnand %p2906_p1, %p3271_p9 }
  0x46   : > { %p2909_p6 = pneg %p2908_p8 }
  0x48   : > { %p2914_p12 = pnand %p2912_p11, %p2909_p6 }
  0x4a   : > { %2917 = shalt.err (!%p2914_p12)
}
  0x4b   : > { %s2918_s13 = scalar_lea.vmem %s3261_s17, 128  ;;  %p2926_p5 = scmp.lt.s32.totalorder %s3261_s17, %s3261_s17 }
  0x4c   : > { %p2919_p13 = scmp.ne.s32.totalorder %s3261_s17, %s2918_s13  ;;  %p2927_p10 = scmp.lt.s32.totalorder %s2918_s13, %s2918_s13 }
  0x4e   : > { %p2921_p3 = pnand %p2919_p13, %p3271_p9  ;;  %p2928_p2 = por %p2927_p10, %p2926_p5 }
  0x50   : > { %p2922_p4 = pneg %p2921_p3 }
  0x52   : > { %p2929_p0 = pnand %p2928_p2, %p2922_p4 }
  0x54   : > { %2932 = shalt.err (!%p2929_p0)
}
  0x55   : > { %2696 = dma.hbm_to_vmem [thread:$0]  (!%p3251_p7), %s5353_s3, 128, %s3261_s17, [#allocation9]  }
  0x56   : > { %s3135_s19 = smov [#allocation10]   ;;  %s248_s26 = sand.u32 1, %s3127_s23  }
  0x57   : > { %s237_s20 = sshll.u32 %s3135_s19, 4  ;;  %s2933_s12 = scalar_lea.hbm %s5272_s4, 128  ;;  %s238_s20 = int_to_ptr.vmem [resolvable:$true] %s237_s20 }
  0x58   : > { %p2934_p1 = scmp.ne.s32.totalorder %s5272_s4, %s2933_s12  ;;  %p2940_p11 = scmp.lt.u32.totalorder %s2933_s12, %s5272_s4 }
  0x5a   : > { %p2936_p8 = pnand %p2934_p1, %p3271_p9 }
  0x5c   : > { %p2937_p6 = pneg %p2936_p8 }
  0x5e   : > { %p2942_p12 = pnand %p2940_p11, %p2937_p6 }
  0x60   : > { %2945 = shalt.err (!%p2942_p12)
}
  0x61   : > { %s2946_s17 = scalar_lea.vmem %s238_s20, 128  ;;  %p2954_p5 = scmp.lt.s32.totalorder %s238_s20, %s238_s20 }
  0x62   : > { %p2947_p13 = scmp.ne.s32.totalorder %s238_s20, %s2946_s17  ;;  %p2955_p10 = scmp.lt.s32.totalorder %s2946_s17, %s2946_s17 }
  0x64   : > { %p2949_p3 = pnand %p2947_p13, %p3271_p9  ;;  %p2956_p2 = por %p2955_p10, %p2954_p5 }
  0x66   : > { %p2950_p4 = pneg %p2949_p3 }
  0x68   : > { %p2957_p0 = pnand %p2956_p2, %p2950_p4 }
  0x6a   : > { %2960 = shalt.err (!%p2957_p0)
}
  0x6b   : > { %2699 = dma.hbm_to_vmem [thread:$0]  (!%p3251_p7), %s5272_s4, 128, %s238_s20, [#allocation9]  }
  0x6c   : > { %s3329_s2 = smul.u32 320, %s248_s26  ;;  %s2567_s29 = sshll.u32 %s3131_s24, 10 }
  0x6d   : > { %s5354_s0 = sld [smem:[#allocation64_spill]]  ;;  %s3342_s13 = scalar_lea.sflag [#allocation3], %s248_s26 }
  0x6e   : > { %s252_s14 = scalar_lea.vmem [#allocation2], %s3329_s2  ;;  %p5355_p9 = scmp.ne.s32.totalorder %s5350_s15, 0 }
  0x6f   : > { %s259_s16 = sshll.u32 %s252_s14, 4  ;;  %s3340_s16 = int_to_ptr.vmem [resolvable:$true] %s259_s16 }
  0x70   : > { %p2963_p1 = pneg %p5355_p9 }
  0x73   : > { %s3337_s12 = scalar_lea.hbm %s5354_s0, %s2567_s29  ;;  %s2966_s18 = scalar_lea.hbm %s5354_s0, 10240 }
  0x74   : > { %s2961_s20 = scalar_lea.hbm %s3337_s12, 5120  ;;  %p2967_p11 = scmp.lt.u32.totalorder %s3337_s12, %s5354_s0 }
  0x75   : > { %p2962_p7 = scmp.ne.s32.totalorder %s3337_s12, %s2961_s20  ;;  %p2968_p12 = scmp.lt.u32.totalorder %s2966_s18, %s2961_s20 }
  0x76   : > { %p2970_p3 = scmp.lt.u32.totalorder %s2961_s20, %s3337_s12 }
  0x77   : > { %p2964_p8 = pnand %p2963_p1, %p2962_p7  ;;  %p2969_p13 = por %p2968_p12, %p2967_p11 }
  0x79   : > { %p2965_p6 = pneg %p2964_p8  ;;  %p2971_p4 = por %p2970_p3, %p2969_p13 }
  0x7b   : > { %p2972_p5 = pnand %p2971_p4, %p2965_p6 }
  0x7d   : > { %2975 = shalt.err (!%p2972_p5)
}
  0x7e   : > { %s2976_s26 = scalar_lea.vmem %s3340_s16, 5120  ;;  %s3136_s7 = smov [#allocation2]  }
  0x7f   : > { %p2977_p10 = scmp.ne.s32.totalorder %s3340_s16, %s2976_s26  ;;  %s2981_s14 = sshll.u32 %s3136_s7, 4  ;;  %s2982_s14 = int_to_ptr.vmem [resolvable:$false] %s2981_s14 }
  0x80   : > { %s2983_s30 = scalar_lea.vmem %s2982_s14, 10240  ;;  %p2984_p7 = scmp.lt.s32.totalorder %s3340_s16, %s2982_s14 }
  0x81   : > { %p2979_p2 = pnand %p2977_p10, %p2963_p1  ;;  %p2985_p8 = scmp.lt.s32.totalorder %s2983_s30, %s2976_s26 }
  0x83   : > { %p2980_p0 = pneg %p2979_p2  ;;  %p2986_p11 = por %p2985_p8, %p2984_p7 }
  0x85   : > { %p2987_p12 = pnand %p2986_p11, %p2980_p0 }
  0x87   : > { %2990 = shalt.err (!%p2987_p12)
}
  0x88   : > { %s3137_s20 = smov 2048   ;;  %s3138_s17 = smov 1024  }
  0x89   : > { %s3139_s18 = smov 64   ;;  %s3378_s26 = scalar_lea.hbm %s5269_s1, %s2567_s29 }
  0x8a   : > { %2703 = dma.hbm_to_vmem [thread:$0]  (!%p5355_p9), %s3337_s12, 5120, %s3340_s16, %s3342_s13, %s3137_s20, %s3138_s17, %s3139_s18  }
  0x8b   : > { %s269_s7 = sand.u32 1, %s3131_s24   ;;  %s273_s14 = scalar_lea.vmem [#allocation5], %s3329_s2 }
  0x8c   : > { %s280_s30 = sshll.u32 %s273_s14, 4  ;;  %s3384_s0 = scalar_lea.sflag [#allocation6], %s269_s7  ;;  %s3382_s30 = int_to_ptr.vmem [resolvable:$true] %s280_s30 }
  0x8d   : > { %s2991_s3 = scalar_lea.hbm %s3378_s26, 5120  ;;  %s2996_s16 = scalar_lea.hbm %s5269_s1, 10240 }
  0x8e   : > { %p2992_p6 = scmp.ne.s32.totalorder %s3378_s26, %s2991_s3  ;;  %p2997_p4 = scmp.lt.u32.totalorder %s3378_s26, %s5269_s1 }
  0x8f   : > { %p2998_p5 = scmp.lt.u32.totalorder %s2996_s16, %s2991_s3  ;;  %p3000_p2 = scmp.lt.u32.totalorder %s2991_s3, %s3378_s26 }
  0x90   : > { %p2994_p13 = pnand %p2992_p6, %p2963_p1 }
  0x91   : > { %p2999_p10 = por %p2998_p5, %p2997_p4 }
  0x92   : > { %p2995_p3 = pneg %p2994_p13 }
  0x93   : > { %p3001_p0 = por %p3000_p2, %p2999_p10 }
  0x95   : > { %p3002_p7 = pnand %p3001_p0, %p2995_p3 }
  0x97   : > { %3005 = shalt.err (!%p3002_p7)
}
  0x98   : > { %s3006_s2 = scalar_lea.vmem %s3382_s30, 5120  ;;  %s3140_s28 = smov [#allocation5]  }
  0x99   : > { %p3007_p8 = scmp.ne.s32.totalorder %s3382_s30, %s3006_s2  ;;  %s3011_s7 = sshll.u32 %s3140_s28, 4  ;;  %s3012_s7 = int_to_ptr.vmem [resolvable:$false] %s3011_s7 }
  0x9a   : > { %s3013_s14 = scalar_lea.vmem %s3012_s7, 10240  ;;  %p3014_p6 = scmp.lt.s32.totalorder %s3382_s30, %s3012_s7 }
  0x9b   : > { %p3009_p11 = pnand %p3007_p8, %p2963_p1  ;;  %p3015_p13 = scmp.lt.s32.totalorder %s3013_s14, %s3006_s2 }
  0x9d   : > { %p3010_p12 = pneg %p3009_p11  ;;  %p3016_p4 = por %p3015_p13, %p3014_p6 }
  0x9f   : > { %p3017_p5 = pnand %p3016_p4, %p3010_p12 }
  0xa1   : > { %3020 = shalt.err (!%p3017_p5)
}
  0xa2   : > { %2706 = dma.hbm_to_vmem [thread:$0]  (!%p5355_p9), %s3378_s26, 5120, %s3382_s30, %s3384_s0, %s3137_s20, %s3138_s17, %s3139_s18  }
  0xa3   : > { %p5356_p1 = scmp.ne.s32.totalorder %s5347_s11, 0 }
  0xa5   : > { %292 = sbr.rel (%p5356_p1) target bundleno = 597 (0x255), region = 40 }
  0xac   : > { %s3416_s3 = sand.u32 1, %s3123_s22   ;;  %p5357_p3 = scmp.ne.s32.totalorder %s5344_s8, 0 }
  0xad   : > { %s2669_s12 = smul.u32 320, %s3416_s3  ;;  %s295_s29 = scalar_lea.sflag [#allocation3], %s3416_s3 }
  0xaf   : > { %s3420_s16 = scalar_lea.vmem [#allocation2], %s2669_s12 }
  0xb0   : > { %3094 = dma.done.wait (%p5357_p3), %s295_s29, 5120  }
  0xb1   : > { %3096 = vsyncadd (%p5357_p3), %s295_s29, 4294962176  ;;  %s303_s0 = sand.u32 1, %s3202_s25   ;;  %s3427_s15 = scalar_lea.vmem [#allocation5], %s2669_s12 }
  0xb2   : > { %s304_s11 = scalar_lea.sflag [#allocation6], %s303_s0 }
  0xb3   : > { %3098 = dma.done.wait (%p5357_p3), %s304_s11, 5120  }
  0xb4   : > { %3100 = vsyncadd (%p5357_p3), %s304_s11, 4294962176  ;;  %p5358_p9 = scmp.eq.s32.totalorder %s3202_s25, 0 }
  0xb6   : > { %3102 = dma.done.wait (%p5358_p9), [#allocation6], 128   ;;  %p5359_p10 = pmov %p5358_p9 }
  0xb7   : > { %p5360_p2 = pmov %p5358_p9 }
  0xb8   : > { %3104 = vsyncadd (%p5359_p10), [#allocation6], 4294967168 }
  0xb9   : > { %3106 = dma.done.wait (%p5360_p2), [#allocation9], 256   ;;  %p5361_p0 = pmov %p5360_p2 }
  0xba   : > { %v5280_v0 = vmov 0.0   ;;  %v3142_v1 = vmov 0   ;;  %v363_v2 = vld [vmem:[%s3420_s16 + $0x8] sm:$0xff]  ;;  %v365_v6 = vld [vmem:[%s3420_s16 + $0x18] sm:$0xff]  ;;  %v362_v10 = vld [vmem:[%s3420_s16] sm:$0xff]  ;;  %vm847_vm0 = vcmask 1043456  }
  0xbb   : > { %3108 = vsyncadd (%p5361_p0), [#allocation9], 4294967040  ;;  %936 = vmatprep.mubr.f32.mxu0 %v5280_v0  ;;  %1007 = vmatprep.mubr.f32.mxu1 %v5280_v0  ;;  %v371_v3 = vld [vmem:[%s3420_s16 + $0x48] sm:$0xff]  ;;  %v373_v7 = vld [vmem:[%s3420_s16 + $0x58] sm:$0xff]  ;;  %v443_v11 = vmul.f32 %v363_v2, %v363_v2  ;;  %v445_v21 = vmul.f32 %v365_v6, %v365_v6  ;;  %v442_v35 = vmul.f32 %v362_v10, %v362_v10  ;;  %vm843_vm1 = vcmask 293888   ;;  %s2521_s8 = sshll.u32 %s3416_s3, 6 }
  0xbc   : > { %2763 = vset.pattern.permute.xlu0 %v3142_v1  ;;  %v3446_v4 = vld [vmem:[%s3427_s15 + $0x8] sm:$0xff]  ;;  %v2571_v5 = vpack.c.bf16 %v371_v3, %v363_v2  ;;  %v2579_v9 = vpack.c.bf16 %v373_v7, %v365_v6  ;;  %v370_v13 = vld [vmem:[%s3420_s16 + $0x40] sm:$0xff]  ;;  %v3458_v14 = vld [vmem:[%s3427_s15 + $0x18] sm:$0xff]  ;;  %v451_v16 = vmul.f32 %v371_v3, %v371_v3  ;;  %v453_v26 = vmul.f32 %v373_v7, %v373_v7  ;;  %s5055_s20 = scalar_lea.vmem [#allocation11], %s2521_s8  ;;  %s5105_s17 = scalar_lea.vmem [#allocation12], %s2521_s8 }
  0xbd   : > { %v3451_v8 = vld [vmem:[%s3427_s15 + $0x48] sm:$0xff]  ;;  %v483_v12 = vmul.f32 %v3446_v4, %v3446_v4  ;;  %v3461_v15 = vld [vmem:[%s3427_s15 + $0x58] sm:$0xff]  ;;  %v2573_v18 = vpack.c.bf16 %v370_v13, %v362_v10  ;;  %v364_v19 = vld [vmem:[%s3420_s16 + $0x10] sm:$0xff]  ;;  %v485_v27 = vmul.f32 %v3458_v14, %v3458_v14  ;;  %v450_v40 = vmul.f32 %v370_v13, %v370_v13  ;;  %s2569_s18 = sshll.u32 %s3202_s25, 10  ;;  %s2354_s26 = sshll.u32 %s5105_s17, 4  ;;  %s5186_s26 = int_to_ptr.vmem [resolvable:$true] %s2354_s26 }
  0xbe   : > { %2572 = vmatprep.subr.bf16.mxu0 %v2571_v5  ;;  %2580 = vmatprep.subr.bf16.mxu1 %v2579_v9  ;;  %v491_v17 = vmul.f32 %v3451_v8, %v3451_v8  ;;  %v372_v20 = vld [vmem:[%s3420_s16 + $0x50] sm:$0xff]  ;;  %v3468_v22 = vld [vmem:[%s3427_s15] sm:$0xff]  ;;  %v379_v23 = vld [vmem:[%s3420_s16 + $0x88] sm:$0xff]  ;;  %v493_v28 = vmul.f32 %v3461_v15, %v3461_v15  ;;  %v444_v48 = vmul.f32 %v364_v19, %v364_v19  ;;  %s5182_s19 = scalar_lea.hbm %s5274_s6, %s2569_s18  ;;  %s2340_s2 = sshll.u32 %s5055_s20, 4  ;;  %s5225_s2 = int_to_ptr.vmem [resolvable:$true] %s2340_s2 }
  0xbf   : > { %v3472_v24 = vld [vmem:[%s3420_s16 + $0xc8] sm:$0xff]  ;;  %v3474_v25 = vadd.f32 %v483_v12, %v443_v11  ;;  %v3481_v29 = vld [vmem:[%s3427_s15 + $0x40] sm:$0xff]  ;;  %2574 = vmatpush1.bf16.msra.mxu0 %v2573_v18  ;;  %v381_v30 = vld [vmem:[%s3420_s16 + $0x98] sm:$0xff]  ;;  %v2581_v33 = vpack.c.bf16 %v372_v20, %v364_v19  ;;  %v482_v41 = vmul.f32 %v3468_v22, %v3468_v22  ;;  %v3507_v46 = vadd.f32 %v485_v27, %v445_v21  ;;  %s2326_s28 = scalar_lea.sflag [#allocation13], %s3416_s3  ;;  %s3021_s7 = scalar_lea.vmem %s5186_s26, 1024 }
  0xc0   : > { %v389_v31 = vld [vmem:[%s3420_s16 + $0xd8] sm:$0xff]  ;;  %v3486_v32 = vld [vmem:[%s3427_s15 + $0x10] sm:$0xff]  ;;  %v3488_v34 = vadd.f32 %v491_v17, %v451_v16  ;;  %v2575_v37 = vpack.c.bf16 %v3472_v24, %v379_v23  ;;  %v378_v38 = vld [vmem:[%s3420_s16 + $0x80] sm:$0xff]  ;;  %v490_v42 = vmul.f32 %v3481_v29, %v3481_v29  ;;  %v3509_v47 = vadd.f32 %v493_v28, %v453_v26  ;;  %p3022_p7 = scmp.ne.s32.totalorder %s5186_s26, %s3021_s7  ;;  %p5550_p8 = scmp.ne.s32.totalorder %s5345_s9, 0 }
  0xc1   : > { %v3491_v36 = vld [vmem:[%s3427_s15 + $0x50] sm:$0xff]  ;;  %v386_v39 = vld [vmem:[%s3420_s16 + $0xc0] sm:$0xff]  ;;  %2582 = vmatpush1.bf16.msra.mxu1 %v2581_v33  ;;  %v2583_v43 = vpack.c.bf16 %v389_v31, %v381_v30  ;;  %2764 = vrsqrt.f32 %v3474_v25  ;;  %v452_v52 = vmul.f32 %v372_v20, %v372_v20  ;;  %v484_v53 = vmul.f32 %v3486_v32, %v3486_v32  ;;  %v395_v57 = vld [vmem:[%s3420_s16 + $0x108] sm:$0xf]  ;;  %s3144_s14 = smov [#allocation12]  }
  0xc2   : > { %v3501_v44 = vld [vmem:[%s3427_s15 + $0x80] sm:$0xff]  ;;  %2576 = vmatprep.subr.bf16.mxu0 %v2575_v37  ;;  %v380_v49 = vld [vmem:[%s3420_s16 + $0x90] sm:$0xff]  ;;  %v492_v54 = vmul.f32 %v3491_v36, %v3491_v36  ;;  %v2577_v55 = vpack.c.bf16 %v386_v39, %v378_v38  ;;  %v458_v58 = vmul.f32 %v378_v38, %v378_v38  ;;  %v466_v59 = vmul.f32 %v386_v39, %v386_v39  ;;  %v397_v62 = vld [vmem:[%s3420_s16 + $0x118] sm:$0xf]  ;;  %p3023_p11 = pnand %p3022_p7, %p5550_p8  ;;  %s3025_s12 = sshll.u32 %s3144_s14, 4  ;;  %s3026_s12 = int_to_ptr.vmem [resolvable:$false] %s3025_s12 }
  0xc3   : > { %v3504_v45 = vld [vmem:[%s3427_s15 + $0xc0] sm:$0xff]  ;;  %v388_v50 = vld [vmem:[%s3420_s16 + $0xd0] sm:$0xff]  ;;  %2584 = vmatprep.subr.bf16.mxu1 %v2583_v43  ;;  %v498_v60 = vmul.f32 %v3501_v44, %v3501_v44  ;;  %v3529_v63 = vadd.f32 %v482_v41, %v442_v35  ;;  %v460_v1 = vmul.f32 %v380_v49, %v380_v49  ;;  %v367_v6 = vld [vmem:[%s3420_s16 + $0x28] sm:$0xff]  ;;  %v3536_v9 = vadd.f32 %v490_v42, %v450_v40  ;;  %s3027_s29 = scalar_lea.vmem %s3026_s12, 2048  ;;  %p3028_p6 = scmp.lt.s32.totalorder %s5186_s26, %s3026_s12 }
  0xc4   : > { %v3514_v51 = vld [vmem:[%s3427_s15 + $0x90] sm:$0xff]  ;;  %v506_v61 = vmul.f32 %v3504_v45, %v3504_v45  ;;  %2578 = vmatpush1.bf16.msra.mxu0 %v2577_v55  ;;  %v2585_v3 = vpack.c.bf16 %v388_v50, %v380_v49  ;;  %v394_v5 = vld [vmem:[%s3420_s16 + $0x100] sm:$0xf]  ;;  %v375_v7 = vld [vmem:[%s3420_s16 + $0x68] sm:$0xff]  ;;  %v3538_v10 = vmul.f32 %v379_v23, %v379_v23  ;;  %v468_v11 = vmul.f32 %v388_v50, %v388_v50  ;;  %p3024_p12 = pneg %p3023_p11  ;;  %p3029_p13 = scmp.lt.s32.totalorder %s3027_s29, %s3021_s7 }
  0xc5   : > { %v3521_v56 = vld [vmem:[%s3427_s15 + $0xd0] sm:$0xff]  ;;  %v500_v2 = vmul.f32 %v3514_v51, %v3514_v51  ;;  %2523 = vmatprep.subr.msk.mxu0 %vm847_vm0, %v395_v57  ;;  %v3544_v16 = vld [vmem:[#allocation7] sm:$0xff]  ;;  %v369_v17 = vld [vmem:[%s3420_s16 + $0x38] sm:$0xff]  ;;  %v3548_v19 = vadd.f32 %v484_v53, %v444_v48  ;;  %v3550_v20 = vadd.f32 %v492_v54, %v452_v52  ;;  %v3554_v21 = vmul.f32 %v3472_v24, %v3472_v24 }
  0xc6   : > { %v508_v12 = vmul.f32 %v3521_v56, %v3521_v56  ;;  %v396_v13 = vld [vmem:[%s3420_s16 + $0x110] sm:$0xf]  ;;  %v377_v18 = vld [vmem:[%s3420_s16 + $0x78] sm:$0xff]  ;;  %v3556_v23 = vmul.f32 %v381_v30, %v381_v30  ;;  %2586 = vmatpush1.bf16.msra.mxu1 %v2585_v3  ;;  %v366_v26 = vld [vmem:[%s3420_s16 + $0x20] sm:$0xff]  ;;  %v3561_v33 = vmul.f32 %v389_v31, %v389_v31  ;;  %v3563_v35 = vadd.f32 %v498_v60, %v458_v58  ;;  %p3030_p4 = por %p3029_p13, %p3028_p6 }
  0xc7   : > { %5362 = vst [vmem:[#allocation21_spill] sm:$0xff] %v3548_v19  ;;  %v374_v27 = vld [vmem:[%s3420_s16 + $0x60] sm:$0xff]  ;;  %v368_v28 = vld [vmem:[%s3420_s16 + $0x30] sm:$0xff]  ;;  %v3565_v37 = vadd.f32 %v506_v61, %v466_v59  ;;  %2526 = vmatprep.subr.msk.mxu1 %vm847_vm0, %v397_v62  ;;  %v2587_v38 = vpack.c.bf16 %v375_v7, %v367_v6  ;;  %v383_v24 = vld [vmem:[%s3420_s16 + $0xa8] sm:$0xff]  ;;  %v3571_v40 = vadd.f32 %v500_v2, %v460_v1  ;;  %2766 = vrsqrt.f32 %v3488_v34 }
  0xc8   : > { %v376_v39 = vld [vmem:[%s3420_s16 + $0x70] sm:$0xff]  ;;  %v391_v30 = vld [vmem:[%s3420_s16 + $0xe8] sm:$0xff]  ;;  %v3573_v41 = vmul.f32 %v395_v57, %v395_v57  ;;  %v3575_v42 = vmul.f32 %v397_v62, %v397_v62  ;;  %2524 = vmatpush1.msk.msra.mxu0 %vm847_vm0, %v394_v5  ;;  %v2595_v31 = vpack.c.bf16 %v377_v18, %v369_v17  ;;  %v385_v43 = vld [vmem:[%s3420_s16 + $0xb8] sm:$0xff]  ;;  %v3581_v49 = vadd.f32 %v508_v12, %v468_v11  ;;  %p3031_p5 = pnand %p3030_p4, %p3024_p12 }
  0xc9   : > { %5363 = vst [vmem:[#allocation22_spill] sm:$0xff] %v3565_v37  ;;  %v393_v48 = vld [vmem:[%s3420_s16 + $0xf8] sm:$0xff]  ;;  %v3583_v50 = vmul.f32 %v394_v5, %v394_v5  ;;  %2525 = vmatmul.mubr.msk.f32.vlgmr.msra.gmra.mrb[0].mxu0 %vm843_vm1, %v3544_v16  ;;  %2588 = vmatprep.subr.bf16.mxu0 %v2587_v38  ;;  %v2589_v52 = vpack.c.bf16 %v374_v27, %v366_v26  ;;  %v382_v53 = vld [vmem:[%s3420_s16 + $0xa0] sm:$0xff]  ;;  %v384_v60 = vld [vmem:[%s3420_s16 + $0xb0] sm:$0xff]  ;;  %2768 = vrsqrt.f32 %v3507_v46  ;;  %vm571_vm2 = vcmp.eq.f32.partialorder %v3474_v25, inf }
  0xca   : > { %v390_v54 = vld [vmem:[%s3420_s16 + $0xe0] sm:$0xff]  ;;  %v3589_v55 = vmul.f32 %v396_v13, %v396_v13  ;;  %2527 = vmatpush1.msk.msra.mxu1 %vm847_vm0, %v396_v13  ;;  %v3592_v57 = vmul.f32 %v367_v6, %v367_v6  ;;  %v2597_v58 = vpack.c.bf16 %v376_v39, %v368_v28  ;;  %v2591_v59 = vpack.c.bf16 %v391_v30, %v383_v24  ;;  %v392_v61 = vld [vmem:[%s3420_s16 + $0xf0] sm:$0xff] }
  0xcb   : > { %v3596_v62 = vpop.eup %2764  ;;  %2528 = vmatmul.mubr.msk.f32.vlgmr.msra.gmra.mrb[0].mxu1 %vm843_vm1, %v3544_v16  ;;  %v3601_v1 = vmul.f32 %v375_v7, %v375_v7  ;;  %v3603_v2 = vmul.f32 %v369_v17, %v369_v17  ;;  %2596 = vmatprep.subr.bf16.mxu1 %v2595_v31  ;;  %v2599_v3 = vpack.c.bf16 %v393_v48, %v385_v43  ;;  %2770 = vrsqrt.f32 %v3509_v47  ;;  %v399_v17 = vld [vmem:[%s3420_s16 + $0x128] sm:$0xf] }
  0xcc   : > { %v3606_v5 = vmul.f32 %v377_v18, %v377_v18  ;;  %v3608_v6 = vmul.f32 %v366_v26, %v366_v26  ;;  %2590 = vmatpush1.bf16.msra.mxu0 %v2589_v52  ;;  %2598 = vmatpush1.bf16.msra.mxu1 %v2597_v58  ;;  %v2593_v11 = vpack.c.bf16 %v390_v54, %v382_v53  ;;  %2772 = vrsqrt.f32 %v3529_v63  ;;  %v401_v52 = vld [vmem:[%s3420_s16 + $0x138] sm:$0xf] }
  0xcd   : > { %v3611_v7 = vmul.f32 %v374_v27, %v374_v27  ;;  %v3613_v12 = vmul.f32 %v368_v28, %v368_v28  ;;  %2592 = vmatprep.subr.bf16.mxu0 %v2591_v59  ;;  %2600 = vmatprep.subr.bf16.mxu1 %v2599_v3  ;;  %v2601_v13 = vpack.c.bf16 %v392_v61, %v384_v60  ;;  %v3627_v27 = vld [vmem:[%s3427_s15 + $0x88] sm:$0xff]  ;;  %2774 = vrsqrt.f32 %v3536_v9 }
  0xce   : > { %v3616_v18 = vmul.f32 %v376_v39, %v376_v39  ;;  %v3618_v26 = vmul.f32 %v383_v24, %v383_v24  ;;  %v3620_v38 = vmul.f32 %v391_v30, %v391_v30  ;;  %v3622_v31 = vmul.f32 %v385_v43, %v385_v43  ;;  %1078 = vmatprep.mubr.f32.mxu0 %v5280_v0  ;;  %v3630_v28 = vld [vmem:[%s3427_s15 + $0xc8] sm:$0xff]  ;;  %v398_v43 = vld [vmem:[%s3420_s16 + $0x120] sm:$0xf] }
  0xcf   : > { %v3632_v58 = vmul.f32 %v393_v48, %v393_v48  ;;  %v3634_v39 = vmul.f32 %v382_v53, %v382_v53  ;;  %v3636_v24 = vmul.f32 %v390_v54, %v390_v54  ;;  %v3638_v30 = vmul.f32 %v384_v60, %v384_v60  ;;  %1149 = vmatprep.mubr.f32.mxu1 %v5280_v0  ;;  %v400_v53 = vld [vmem:[%s3420_s16 + $0x130] sm:$0xf]  ;;  %v421_v54 = vld [vmem:[%s3427_s15 + $0x98] sm:$0xff] }
  0xd0   : > { %2594 = vmatpush1.bf16.msra.mxu0 %v2593_v11  ;;  %v3643_v59 = vmul.f32 %v392_v61, %v392_v61  ;;  %2602 = vmatpush1.bf16.msra.mxu1 %v2601_v13  ;;  %v3645_v3 = vmul.f32 %v399_v17, %v399_v17  ;;  %v3647_v48 = vmul.f32 %v401_v52, %v401_v52  ;;  %v429_v60 = vld [vmem:[%s3427_s15 + $0xd8] sm:$0xff]  ;;  %2776 = vrsqrt.f32 %v3548_v19  ;;  %v3662_v13 = vld [vmem:[%s3427_s15 + $0x108] sm:$0xf] }
  0xd1   : > { %5364 = vst [vmem:[#allocation23_spill] sm:$0xff] %v3634_v39  ;;  %5365 = vst [vmem:[#allocation24_spill] sm:$0xff] %v3636_v24  ;;  %2529 = vmatprep.subr.msk.mxu0 %vm847_vm0, %v399_v17  ;;  %2532 = vmatprep.subr.msk.mxu1 %vm847_vm0, %v401_v52  ;;  %v3655_v0 = vmul.f32 %v398_v43, %v398_v43  ;;  %v499_v61 = vmul.f32 %v3627_v27, %v3627_v27  ;;  %v3678_v24 = vpop.eup %2766  ;;  %2778 = vrsqrt.f32 %v3550_v20 }
  0xd2   : > { %5366 = vst [vmem:[#allocation25_spill] sm:$0xff] %v3638_v30  ;;  %5367 = vst [vmem:[#allocation26_spill] sm:$0xff] %v3643_v59  ;;  %v507_v11 = vmul.f32 %v3630_v28, %v3630_v28  ;;  %v3667_v59 = vmul.f32 %v400_v53, %v400_v53  ;;  %v2603_v17 = vpack.c.bf16 %v3451_v8, %v3446_v4  ;;  %v3676_v30 = vld [vmem:[%s3427_s15 + $0x100] sm:$0xf]  ;;  %v3685_v8 = vld [vmem:[%s3427_s15 + $0x110] sm:$0xf]  ;;  %2780 = vrsqrt.f32 %v3563_v35 }
  0xd3   : > { %5368 = vst [vmem:[#allocation27_spill] sm:$0xff] %v3645_v3  ;;  %5369 = vst [vmem:[#allocation28_spill] sm:$0xff] %v3647_v48  ;;  %v3665_v48 = vld [vmem:[%s3427_s15 + $0x118] sm:$0xf]  ;;  %v1772_v3 = vld [vmem:[#allocation8] sm:$0xff]  ;;  %v2611_v52 = vpack.c.bf16 %v3461_v15, %v3458_v14  ;;  %v2613_v39 = vpack.c.bf16 %v3491_v36, %v3486_v32  ;;  %v501_v19 = vmul.f32 %v421_v54, %v421_v54  ;;  %v3700_v36 = vpop.eup %2768  ;;  %2782 = vrsqrt.f32 %v3565_v37 }
  0xd4   : > { %5370 = vst [vmem:[#allocation29_spill] sm:$0xff] %v3655_v0  ;;  %5371 = vst [vmem:[#allocation30_spill] sm:$0xff] %v3667_v59  ;;  %v2605_v0 = vpack.c.bf16 %v3481_v29, %v3468_v22  ;;  %1904 = vperm.xlu0 %2763, %v1772_v3   ;;  %v2607_v59 = vpack.c.bf16 %v3630_v28, %v3627_v27  ;;  %v509_v4 = vmul.f32 %v429_v60, %v429_v60  ;;  %v3688_v14 = vld [vmem:[%s3427_s15 + $0x28] sm:$0xff]  ;;  %v1773_v37 = vld [vmem:[#allocation10] sm:$0xff] }
  0xd5   : > { %2530 = vmatpush1.msk.msra.mxu0 %vm847_vm0, %v398_v43  ;;  %2533 = vmatpush1.msk.msra.mxu1 %vm847_vm0, %v400_v53  ;;  %v2615_v15 = vpack.c.bf16 %v429_v60, %v421_v54  ;;  %v515_v22 = vmul.f32 %v3662_v13, %v3662_v13  ;;  %v517_v29 = vmul.f32 %v3665_v48, %v3665_v48  ;;  %v3698_v32 = vld [vmem:[%s3427_s15 + $0x68] sm:$0xff]  ;;  %v3715_v3 = vpop.eup %2770  ;;  %v3725_v54 = vld [vmem:[%s3427_s15 + $0x38] sm:$0xff]  ;;  %2784 = vrsqrt.f32 %v3571_v40 }
  0xd6   : > { %2531 = vmatmul.mubr.msk.f32.vlgmr.msra.gmra.mrb[2].mxu0 %vm843_vm1, %v3544_v16  ;;  %2534 = vmatmul.mubr.msk.f32.vlgmr.msra.gmra.mrb[2].mxu1 %vm843_vm1, %v3544_v16  ;;  %v3708_v27 = vadd.f32 %v499_v61, %v3538_v10  ;;  %v3711_v28 = vadd.f32 %v507_v11, %v3554_v21  ;;  %v514_v43 = vmul.f32 %v3676_v30, %v3676_v30  ;;  %v3728_v60 = vld [vmem:[%s3427_s15 + $0x78] sm:$0xff]  ;;  %v3730_v61 = vpop.eup %2772  ;;  %2786 = vrsqrt.f32 %v3581_v49 }
  0xd7   : > { %2604 = vmatprep.subr.bf16.mxu0 %v2603_v17  ;;  %2612 = vmatprep.subr.bf16.mxu1 %v2611_v52  ;;  %v2609_v53 = vpack.c.bf16 %v3504_v45, %v3501_v44  ;;  %v516_v10 = vmul.f32 %v3685_v8, %v3685_v8  ;;  %v487_v21 = vmul.f32 %v3688_v14, %v3688_v14  ;;  %v3741_v17 = vld [vmem:[%s3427_s15 + $0x20] sm:$0xff]  ;;  %vm573_vm3 = vcmp.eq.f32.partialorder %v3474_v25, 0.0 }
  0xd8   : > { %2606 = vmatpush1.bf16.msra.mxu0 %v2605_v0  ;;  %2614 = vmatpush1.bf16.msra.mxu1 %v2613_v39  ;;  %v3734_v11 = vadd.f32 %v501_v19, %v3556_v23  ;;  %v2617_v44 = vpack.c.bf16 %v3521_v56, %v3514_v51  ;;  %v495_v45 = vmul.f32 %v3698_v32, %v3698_v32  ;;  %v3744_v52 = vld [vmem:[%s3427_s15 + $0x60] sm:$0xff]  ;;  %v5374_v23 = vmov 0.0  }
  0xd9   : > { %2608 = vmatprep.subr.bf16.mxu0 %v2607_v59  ;;  %v3748_v0 = vadd.f32 %v509_v4, %v3561_v33  ;;  %2616 = vmatprep.subr.bf16.mxu1 %v2615_v15  ;;  %v3751_v51 = vadd.f32 %v515_v22, %v3573_v41  ;;  %v3754_v56 = vadd.f32 %v517_v29, %v3575_v42  ;;  %v3766_v59 = vld [vmem:[%s3427_s15 + $0x30] sm:$0xff]  ;;  %v3772_v42 = vld [vmem:[%s3427_s15 + $0xa8] sm:$0xff]  ;;  %v3775_v4 = vpop.eup %2774  ;;  %vm627_vm4 = vcmp.eq.f32.partialorder %v3488_v34, inf }
  0xda   : > { %v3757_v19 = vadd.f32 %v514_v43, %v3583_v50  ;;  %1244 = vmatprep.mubr.f32.mxu0 %v5374_v23  ;;  %1315 = vmatprep.mubr.f32.mxu1 %v5374_v23  ;;  %v489_v39 = vmul.f32 %v3725_v54, %v3725_v54  ;;  %v497_v33 = vmul.f32 %v3728_v60, %v3728_v60  ;;  %v3769_v41 = vld [vmem:[%s3427_s15 + $0x70] sm:$0xff]  ;;  %vm585_vm5 = vcmp.eq.f32.partialorder %v3507_v46, inf }
  0xdb   : > { %5372 = vst [vmem:[#allocation31_spill] sm:$0xff] %v3754_v56  ;;  %v3778_v15 = vadd.f32 %v516_v10, %v3589_v55  ;;  %v3781_v22 = vadd.f32 %v487_v21, %v3592_v57  ;;  %v486_v29 = vmul.f32 %v3741_v17, %v3741_v17  ;;  %v494_v43 = vmul.f32 %v3744_v52, %v3744_v52  ;;  %v3790_v56 = vpop.eup %2776  ;;  %v425_v21 = vld [vmem:[%s3427_s15 + $0xb8] sm:$0xff] }
  0xdc   : > { %5373 = vst [vmem:[#allocation32_spill] sm:$0xff] %v3757_v19  ;;  %v3788_v19 = vld [vmem:[%s3427_s15 + $0xe8] sm:$0xff]  ;;  %2301 = vperm.xlu0 %2763, %v1773_v37   ;;  %2610 = vmatpush1.bf16.msra.mxu0 %v2609_v53  ;;  %v3793_v55 = vadd.f32 %v495_v45, %v3601_v1  ;;  %v2619_v57 = vpack.c.bf16 %v3698_v32, %v3688_v14  ;;  %v433_v32 = vld [vmem:[%s3427_s15 + $0xf8] sm:$0xff]  ;;  %vm629_vm6 = vcmp.eq.f32.partialorder %v3488_v34, 0.0  ;;  %vm587_vm7 = vcmp.eq.f32.partialorder %v3507_v46, 0.0 }
  0xdd   : > { %2618 = vmatpush1.bf16.msra.mxu1 %v2617_v44  ;;  %v2627_v10 = vpack.c.bf16 %v3728_v60, %v3725_v54  ;;  %2535 = vmatprep.subr.msk.mxu0 %vm847_vm0, %v3662_v13  ;;  %v488_v37 = vmul.f32 %v3766_v59, %v3766_v59  ;;  %v496_v1 = vmul.f32 %v3769_v41, %v3769_v41  ;;  %v3828_v60 = vpop.eup %2778  ;;  %vm641_vm8 = vcmp.eq.f32.partialorder %v3509_v47, inf }
  0xde   : > { %2538 = vmatprep.subr.msk.mxu1 %vm847_vm0, %v3665_v48  ;;  %v503_v14 = vmul.f32 %v3772_v42, %v3772_v42  ;;  %v3817_v48 = vadd.f32 %v489_v39, %v3603_v2  ;;  %v3820_v13 = vadd.f32 %v497_v33, %v3606_v5  ;;  %v2621_v53 = vpack.c.bf16 %v3744_v52, %v3741_v17  ;;  %v422_v17 = vld [vmem:[%s3427_s15 + $0xa0] sm:$0xff]  ;;  %v3840_v39 = vpop.eup %2780 }
  0xdf   : > { %v511_v54 = vmul.f32 %v3788_v19, %v3788_v19  ;;  %v3831_v2 = vadd.f32 %v486_v29, %v3608_v6  ;;  %v3834_v5 = vadd.f32 %v494_v43, %v3611_v7  ;;  %v2629_v44 = vpack.c.bf16 %v3769_v41, %v3766_v59  ;;  %v430_v52 = vld [vmem:[%s3427_s15 + $0xe0] sm:$0xff]  ;;  %v424_v29 = vld [vmem:[%s3427_s15 + $0xb0] sm:$0xff]  ;;  %v3853_v41 = vpop.eup %2782 }
  0xe0   : > { %v505_v45 = vmul.f32 %v425_v21, %v425_v21  ;;  %2536 = vmatpush1.msk.msra.mxu0 %vm847_vm0, %v3676_v30  ;;  %v2623_v6 = vpack.c.bf16 %v3788_v19, %v3772_v42  ;;  %v513_v33 = vmul.f32 %v433_v32, %v433_v32  ;;  %v2631_v7 = vpack.c.bf16 %v433_v32, %v425_v21  ;;  %v3850_v43 = vld [vmem:[%s3427_s15 + $0xf0] sm:$0xff]  ;;  %v3869_v42 = vpop.eup %2784 }
  0xe1   : > { %2539 = vmatpush1.msk.msra.mxu1 %vm847_vm0, %v3685_v8  ;;  %v588_v59 = vand.u32 2147483648, %v3507_v46  ;;  %2537 = vmatmul.mubr.msk.f32.vlgmr.msra.gmra.mrb[4].mxu0 %vm843_vm1, %v3544_v16  ;;  %v3860_v30 = vadd.f32 %v488_v37, %v3613_v12  ;;  %v3863_v8 = vadd.f32 %v496_v1, %v3616_v18  ;;  %v3866_v19 = vadd.f32 %v503_v14, %v3618_v26  ;;  %v3877_v12 = vpop.eup %2786  ;;  %v439_v1 = vld [vmem:[%s3427_s15 + $0x128] sm:$0xf]  ;;  %v441_v14 = vld [vmem:[%s3427_s15 + $0x138] sm:$0xf] }
  0xe2   : > { %2540 = vmatmul.mubr.msk.f32.vlgmr.msra.gmra.mrb[4].mxu1 %vm843_vm1, %v3544_v16  ;;  %2620 = vmatprep.subr.bf16.mxu0 %v2619_v57  ;;  %v3872_v21 = vadd.f32 %v511_v54, %v3620_v38  ;;  %v502_v32 = vmul.f32 %v422_v17, %v422_v17  ;;  %v3874_v50 = vmul.f32 %v430_v52, %v430_v52  ;;  %vm643_vm9 = vcmp.eq.f32.partialorder %v3509_v47, 0.0 }
  0xe3   : > { %2628 = vmatprep.subr.bf16.mxu1 %v2627_v10  ;;  %2622 = vmatpush1.bf16.msra.mxu0 %v2621_v53  ;;  %v3880_v18 = vadd.f32 %v505_v45, %v3622_v31  ;;  %v2625_v26 = vpack.c.bf16 %v430_v52, %v422_v17  ;;  %v2633_v57 = vpack.c.bf16 %v3850_v43, %v424_v29  ;;  %v644_v10 = vand.u32 2147483648, %v3509_v47  ;;  %v5375_v52 = vld [vmem:[#allocation21_spill] sm:$0xff] }
  0xe4   : > { %2630 = vmatpush1.bf16.msra.mxu1 %v2629_v44  ;;  %2624 = vmatprep.subr.bf16.mxu0 %v2623_v6  ;;  %v3885_v38 = vadd.f32 %v513_v33, %v3632_v58  ;;  %v3887_v37 = vmul.f32 %v424_v29, %v424_v29  ;;  %vm564_vm10 = vcmp.eq.f32.partialorder %v3529_v63, inf  ;;  %vm566_vm11 = vcmp.eq.f32.partialorder %v3529_v63, 0.0 }
  0xe5   : > { %2632 = vmatprep.subr.bf16.mxu1 %v2631_v7  ;;  %1386 = vmatprep.mubr.f32.mxu0 %v5374_v23  ;;  %v570_v31 = vmul.f32 %v3596_v62, %v3474_v25  ;;  %v567_v58 = vand.u32 2147483648, %v3529_v63  ;;  %vm620_vm12 = vcmp.eq.f32.partialorder %v3536_v9, inf  ;;  %vm622_vm13 = vcmp.eq.f32.partialorder %v3536_v9, 0.0 }
  0xe6   : > { %1457 = vmatprep.mubr.f32.mxu1 %v5374_v23  ;;  %v626_v53 = vmul.f32 %v3678_v24, %v3488_v34  ;;  %v584_v54 = vmul.f32 %v3700_v36, %v3507_v46  ;;  %v640_v44 = vmul.f32 %v3715_v3, %v3509_v47  ;;  %v623_v45 = vand.u32 2147483648, %v3536_v9  ;;  %v438_v36 = vld [vmem:[%s3427_s15 + $0x120] sm:$0xf]  ;;  %v3919_v3 = vld [vmem:[%s3427_s15 + $0x130] sm:$0xf] }
  0xe7   : > { %2626 = vmatpush1.bf16.msra.mxu0 %v2625_v26  ;;  %v572_v62 = vsel %vm571_vm2, %v3474_v25, %v570_v31  ;;  %v563_v17 = vmul.f32 %v3730_v61, %v3529_v63  ;;  %v619_v24 = vmul.f32 %v3775_v4, %v3536_v9  ;;  %vm578_vm14 = vcmp.eq.f32.partialorder %v5375_v52, inf }
  0xe8   : > { %2634 = vmatpush1.bf16.msra.mxu1 %v2633_v57  ;;  %2541 = vmatprep.subr.msk.mxu0 %vm847_vm0, %v439_v1  ;;  %v5376_v6 = vand.u32 2147483648, %v3474_v25  ;;  %v628_v61 = vsel %vm627_vm4, %v3488_v34, %v626_v53  ;;  %v586_v4 = vsel %vm585_vm5, %v3507_v46, %v584_v54  ;;  %vm580_vm15 = vcmp.eq.f32.partialorder %v5375_v52, 0.0 }
  0xe9   : > { %2544 = vmatprep.subr.msk.mxu1 %vm847_vm0, %v441_v14  ;;  %v5377_v7 = vand.u32 2147483648, %v3488_v34  ;;  %v589_v26 = vsel %vm587_vm7, %v588_v59, %v586_v4  ;;  %v642_v25 = vsel %vm641_vm8, %v3509_v47, %v640_v44  ;;  %v565_v57 = vsel %vm564_vm10, %v3529_v63, %v563_v17 }
  0xea   : > { %v575_v33 = vsel %vm573_vm3, %v5376_v6, %v572_v62  ;;  %v645_v53 = vsel %vm643_vm9, %v644_v10, %v642_v25  ;;  %v568_v54 = vsel %vm566_vm11, %v567_v58, %v565_v57  ;;  %v621_v34 = vsel %vm620_vm12, %v3536_v9, %v619_v24  ;;  %v5378_v9 = vld [vmem:[#allocation23_spill] sm:$0xff]  ;;  %v5379_v62 = vld [vmem:[#allocation24_spill] sm:$0xff] }
  0xeb   : > { %v631_v29 = vsel %vm629_vm6, %v5377_v7, %v628_v61  ;;  %2542 = vmatpush1.msk.msra.mxu0 %vm847_vm0, %v438_v36  ;;  %v2643_v46 = vpack.c.bf16 %v645_v53, %v589_v26  ;;  %v624_v59 = vsel %vm622_vm13, %v623_v45, %v621_v34  ;;  %v577_v47 = vmul.f32 %v3790_v56, %v5375_v52 }
  0xec   : > { %v2635_v31 = vpack.c.bf16 %v631_v29, %v575_v33  ;;  %2545 = vmatpush1.msk.msra.mxu1 %vm847_vm0, %v3919_v3  ;;  %v581_v10 = vand.u32 2147483648, %v5375_v52  ;;  %2543 = vmatmul.mubr.msk.f32.vlgmr.msra.gmra.mrb[6].mxu0 %vm843_vm1, %v3544_v16  ;;  %v2637_v63 = vpack.c.bf16 %v624_v59, %v568_v54  ;;  %v633_v58 = vmul.f32 %v3828_v60, %v3550_v20 }
  0xed   : > { %2546 = vmatmul.mubr.msk.f32.vlgmr.msra.gmra.mrb[6].mxu1 %vm843_vm1, %v3544_v16  ;;  %vm634_vm2 = vcmp.eq.f32.partialorder %v3550_v20, inf  ;;  %vm636_vm3 = vcmp.eq.f32.partialorder %v3550_v20, 0.0  ;;  %v3968_v44 = vadd.f32 %v502_v32, %v5378_v9  ;;  %2644 = vmatprep.subr.bf16.mxu1 %v2643_v46  ;;  %v579_v56 = vsel %vm578_vm14, %v5375_v52, %v577_v47  ;;  %v5382_v9 = vld [vmem:[#allocation31_spill] sm:$0xff] }
  0xee   : > { %2636 = vmatprep.subr.bf16.mxu0 %v2635_v31  ;;  %v637_v45 = vand.u32 2147483648, %v3550_v20  ;;  %2788 = vrsqrt.f32 %v3708_v27  ;;  %v3977_v60 = vadd.f32 %v3874_v50, %v5379_v62  ;;  %v582_v17 = vsel %vm580_vm15, %v581_v10, %v579_v56  ;;  %1552 = vmatprep.mubr.f32.mxu0 %v5374_v23  ;;  %v5380_v50 = vld [vmem:[#allocation25_spill] sm:$0xff] }
  0xef   : > { %2638 = vmatpush1.bf16.msra.mxu0 %v2637_v63  ;;  %v635_v32 = vsel %vm634_vm2, %v3550_v20, %v633_v58  ;;  %v512_v24 = vmul.f32 %v3850_v43, %v3850_v43  ;;  %v3985_v6 = vmul.f32 %v439_v1, %v439_v1  ;;  %2790 = vrsqrt.f32 %v3711_v28  ;;  %1623 = vmatprep.mubr.f32.mxu1 %v5374_v23 }
  0xf0   : > { %v638_v33 = vsel %vm636_vm3, %v637_v45, %v635_v32  ;;  %v3991_v61 = vadd.f32 %v3887_v37, %v5380_v50  ;;  %v3993_v52 = vmul.f32 %v441_v14, %v441_v14  ;;  %2792 = vrsqrt.f32 %v3734_v11  ;;  %v5381_v14 = vld [vmem:[#allocation22_spill] sm:$0xff]  ;;  %v5383_v50 = vld [vmem:[#allocation32_spill] sm:$0xff] }
  0xf1   : > { %v2645_v4 = vpack.c.bf16 %v638_v33, %v582_v17  ;;  %v3996_v20 = vmul.f32 %v438_v36, %v438_v36  ;;  %vm683_vm4 = vcmp.eq.f32.partialorder %v3708_v27, inf  ;;  %vm685_vm5 = vcmp.eq.f32.partialorder %v3708_v27, 0.0 }
  0xf2   : > { %2794 = vrsqrt.f32 %v3748_v0  ;;  %v686_v43 = vand.u32 2147483648, %v3708_v27  ;;  %vm739_vm6 = vcmp.eq.f32.partialorder %v3711_v28, inf  ;;  %vm741_vm7 = vcmp.eq.f32.partialorder %v3711_v28, 0.0 }
  0xf3   : > { %2646 = vmatpush1.bf16.msra.mxu1 %v2645_v4  ;;  %v675_v37 = vmul.f32 %v3840_v39, %v3563_v35  ;;  %v742_v1 = vand.u32 2147483648, %v3711_v28  ;;  %vm697_vm8 = vcmp.eq.f32.partialorder %v3734_v11, inf  ;;  %vm676_vm9 = vcmp.eq.f32.partialorder %v3563_v35, inf  ;;  %v5384_v4 = vld [vmem:[#allocation26_spill] sm:$0xff] }
  0xf4   : > { %v731_v36 = vmul.f32 %v3853_v41, %v5381_v14  ;;  %vm699_vm10 = vcmp.eq.f32.partialorder %v3734_v11, 0.0  ;;  %v700_v7 = vand.u32 2147483648, %v3734_v11  ;;  %vm732_vm11 = vcmp.eq.f32.partialorder %v5381_v14, inf }
  0xf5   : > { %v689_v29 = vmul.f32 %v3869_v42, %v3571_v40  ;;  %vm753_vm12 = vcmp.eq.f32.partialorder %v3748_v0, inf  ;;  %vm678_vm13 = vcmp.eq.f32.partialorder %v3563_v35, 0.0  ;;  %v679_v39 = vand.u32 2147483648, %v3563_v35 }
  0xf6   : > { %vm690_vm14 = vcmp.eq.f32.partialorder %v3571_v40, inf  ;;  %v677_v26 = vsel %vm676_vm9, %v3563_v35, %v675_v37  ;;  %vm734_vm15 = vcmp.eq.f32.partialorder %v5381_v14, 0.0  ;;  %v735_v41 = vand.u32 2147483648, %v5381_v14 }
  0xf7   : > { %v745_v25 = vmul.f32 %v3877_v12, %v3581_v49  ;;  %v733_v42 = vsel %vm732_vm11, %v5381_v14, %v731_v36  ;;  %vm692_vm2 = vcmp.eq.f32.partialorder %v3571_v40, 0.0  ;;  %v693_v31 = vand.u32 2147483648, %v3571_v40 }
  0xf8   : > { %v2789_v57 = vpop.eup %2788  ;;  %vm746_vm3 = vcmp.eq.f32.partialorder %v3581_v49, inf  ;;  %v691_v54 = vsel %vm690_vm14, %v3571_v40, %v689_v29  ;;  %v749_v34 = vand.u32 2147483648, %v3581_v49  ;;  %2796 = vrsqrt.f32 %v3751_v51 }
  0xf9   : > { %v682_v53 = vmul.f32 %v2789_v57, %v3708_v27  ;;  %v2791_v46 = vpop.eup %2790  ;;  %vm755_vm9 = vcmp.eq.f32.partialorder %v3748_v0, 0.0  ;;  %v680_v12 = vsel %vm678_vm13, %v679_v39, %v677_v26  ;;  %v747_v59 = vsel %vm746_vm3, %v3581_v49, %v745_v25 }
  0xfa   : > { %vm748_vm11 = vcmp.eq.f32.partialorder %v3581_v49, 0.0  ;;  %v2793_v47 = vpop.eup %2792  ;;  %v738_v63 = vmul.f32 %v2791_v46, %v3711_v28  ;;  %v736_v58 = vsel %vm734_vm15, %v735_v41, %v733_v42  ;;  %2798 = vrsqrt.f32 %v5382_v9 }
  0xfb   : > { %v684_v10 = vsel %vm683_vm4, %v3708_v27, %v682_v53  ;;  %v696_v45 = vmul.f32 %v2793_v47, %v3734_v11  ;;  %v756_v49 = vand.u32 2147483648, %v3748_v0  ;;  %v694_v62 = vsel %vm692_vm2, %v693_v31, %v691_v54 }
  0xfc   : > { %v2795_v56 = vpop.eup %2794  ;;  %v687_v35 = vsel %vm685_vm5, %v686_v43, %v684_v10  ;;  %v740_v17 = vsel %vm739_vm6, %v3711_v28, %v738_v63  ;;  %v750_v33 = vsel %vm748_vm11, %v749_v34, %v747_v59  ;;  %2800 = vrsqrt.f32 %v5383_v50 }
  0xfd   : > { %v752_v32 = vmul.f32 %v2795_v56, %v3748_v0  ;;  %v4057_v37 = vadd.f32 %v512_v24, %v5384_v4  ;;  %v743_v27 = vsel %vm741_vm7, %v742_v1, %v740_v17  ;;  %v698_v40 = vsel %vm697_vm8, %v3734_v11, %v696_v45 }
  0xfe   : > { %v2641_v43 = vpack.c.bf16 %v736_v58, %v680_v12  ;;  %v2639_v14 = vpack.c.bf16 %v743_v27, %v687_v35  ;;  %v701_v36 = vsel %vm699_vm10, %v700_v7, %v698_v40  ;;  %vm795_vm4 = vcmp.eq.f32.partialorder %v3751_v51, inf }
  0xff   : > { %v754_v29 = vsel %vm753_vm12, %v3748_v0, %v752_v32  ;;  %v2649_v28 = vpack.c.bf16 %v750_v33, %v694_v62  ;;  %vm797_vm5 = vcmp.eq.f32.partialorder %v3751_v51, 0.0  ;;  %2802 = vrsqrt.f32 %v3778_v15 }
 0x100   : > { %v757_v24 = vsel %vm755_vm9, %v756_v49, %v754_v29  ;;  %2640 = vmatprep.subr.bf16.mxu0 %v2639_v14  ;;  %v798_v39 = vand.u32 2147483648, %v3751_v51  ;;  %vm809_vm6 = vcmp.eq.f32.partialorder %v5382_v9, inf  ;;  %2804 = vrsqrt.f32 %v3781_v22 }
 0x101   : > { %v2647_v1 = vpack.c.bf16 %v757_v24, %v701_v36  ;;  %2642 = vmatpush1.bf16.msra.mxu0 %v2641_v43  ;;  %vm811_vm7 = vcmp.eq.f32.partialorder %v5382_v9, 0.0  ;;  %v812_v11 = vand.u32 2147483648, %v5382_v9  ;;  %vm788_vm8 = vcmp.eq.f32.partialorder %v5383_v50, inf }
 0x102   : > { %2806 = vrsqrt.f32 %v3793_v55  ;;  %v2797_v0 = vpop.eup %2796  ;;  %vm790_vm10 = vcmp.eq.f32.partialorder %v5383_v50, 0.0  ;;  %v791_v7 = vand.u32 2147483648, %v5383_v50  ;;  %vm802_vm12 = vcmp.eq.f32.partialorder %v3778_v15, inf }
 0x103   : > { %2648 = vmatprep.subr.bf16.mxu1 %v2647_v1  ;;  %2808 = vrsqrt.f32 %v3817_v48  ;;  %v794_v26 = vmul.f32 %v2797_v0, %v3751_v51  ;;  %vm804_vm13 = vcmp.eq.f32.partialorder %v3778_v15, 0.0  ;;  %v805_v41 = vand.u32 2147483648, %v3778_v15 }
 0x104   : > { %2650 = vmatpush1.bf16.msra.mxu1 %v2649_v28  ;;  %2810 = vrsqrt.f32 %v3820_v13  ;;  %v2799_v25 = vpop.eup %2798  ;;  %vm599_vm14 = vcmp.eq.f32.partialorder %v3781_v22, inf  ;;  %vm601_vm15 = vcmp.eq.f32.partialorder %v3781_v22, 0.0  ;;  %v602_v57 = vand.u32 2147483648, %v3781_v22 }
 0x105   : > { %2812 = vrsqrt.f32 %v3831_v2  ;;  %v796_v42 = vsel %vm795_vm4, %v3751_v51, %v794_v26  ;;  %v808_v31 = vmul.f32 %v2799_v25, %v5382_v9  ;;  %vm655_vm2 = vcmp.eq.f32.partialorder %v3793_v55, inf }
 0x106   : > { %vm657_vm3 = vcmp.eq.f32.partialorder %v3793_v55, 0.0  ;;  %v2801_v53 = vpop.eup %2800  ;;  %v799_v54 = vsel %vm797_vm5, %v798_v39, %v796_v42  ;;  %v658_v34 = vand.u32 2147483648, %v3793_v55  ;;  %vm613_vm9 = vcmp.eq.f32.partialorder %v3817_v48, inf }
 0x107   : > { %2814 = vrsqrt.f32 %v3834_v5  ;;  %2547 = vmatprep.subr.msk.mxu0 %vm847_vm0, %v799_v54  ;;  %v810_v46 = vsel %vm809_vm6, %v5382_v9, %v808_v31  ;;  %v787_v12 = vmul.f32 %v2801_v53, %v5383_v50  ;;  %vm615_vm11 = vcmp.eq.f32.partialorder %v3817_v48, 0.0 }
 0x108   : > { %v616_v59 = vand.u32 2147483648, %v3817_v48  ;;  %v813_v51 = vsel %vm811_vm7, %v812_v11, %v810_v46  ;;  %vm669_vm4 = vcmp.eq.f32.partialorder %v3820_v13, inf  ;;  %vm671_vm5 = vcmp.eq.f32.partialorder %v3820_v13, 0.0 }
 0x109   : > { %2816 = vrsqrt.f32 %v3860_v30  ;;  %v2803_v47 = vpop.eup %2802  ;;  %2550 = vmatprep.subr.msk.mxu1 %vm847_vm0, %v813_v51  ;;  %v789_v10 = vsel %vm788_vm8, %v5383_v50, %v787_v12  ;;  %v672_v63 = vand.u32 2147483648, %v3820_v13  ;;  %vm594_vm7 = vcmp.eq.f32.partialorder %v3831_v2, 0.0 }
 0x10a   : > { %2818 = vrsqrt.f32 %v3863_v8  ;;  %v2805_v58 = vpop.eup %2804  ;;  %v792_v9 = vsel %vm790_vm10, %v791_v7, %v789_v10  ;;  %v801_v56 = vmul.f32 %v2803_v47, %v3778_v15  ;;  %v595_v35 = vand.u32 2147483648, %v3831_v2 }
 0x10b   : > { %2548 = vmatpush1.msk.msra.mxu0 %vm847_vm0, %v792_v9  ;;  %v598_v49 = vmul.f32 %v2805_v58, %v3781_v22  ;;  %vm648_vm8 = vcmp.eq.f32.partialorder %v3834_v5, inf  ;;  %vm650_vm6 = vcmp.eq.f32.partialorder %v3834_v5, 0.0  ;;  %2820 = vrsqrt.f32 %v3866_v19 }
 0x10c   : > { %v2807_v45 = vpop.eup %2806  ;;  %v803_v17 = vsel %vm802_vm12, %v3778_v15, %v801_v56  ;;  %2549 = vmatmul.mubr.msk.f32.vlgmr.msra.gmra.mrb[8].mxu0 %vm843_vm1, %v3544_v16  ;;  %v651_v33 = vand.u32 2147483648, %v3834_v5  ;;  %2822 = vrsqrt.f32 %v3872_v21  ;;  %vm606_vm10 = vcmp.eq.f32.partialorder %v3860_v30, inf }
 0x10d   : > { %v2809_v62 = vpop.eup %2808  ;;  %v654_v32 = vmul.f32 %v2807_v45, %v3793_v55  ;;  %v806_v4 = vsel %vm804_vm13, %v805_v41, %v803_v17  ;;  %v600_v27 = vsel %vm599_vm14, %v3781_v22, %v598_v49  ;;  %1694 = vmatprep.mubr.f32.mxu0 %v5374_v23  ;;  %vm608_vm12 = vcmp.eq.f32.partialorder %v3860_v30, 0.0 }
 0x10e   : > { %v2811_v50 = vpop.eup %2810  ;;  %v612_v40 = vmul.f32 %v2809_v62, %v3817_v48  ;;  %2551 = vmatpush1.msk.msra.mxu1 %vm847_vm0, %v806_v4  ;;  %v603_v14 = vsel %vm601_vm15, %v602_v57, %v600_v27  ;;  %v609_v28 = vand.u32 2147483648, %v3860_v30  ;;  %2824 = vrsqrt.f32 %v3880_v18 }
 0x10f   : > { %v2813_v43 = vpop.eup %2812  ;;  %v656_v15 = vsel %vm655_vm2, %v3793_v55, %v654_v32  ;;  %v668_v36 = vmul.f32 %v2811_v50, %v3820_v13  ;;  %2552 = vmatmul.mubr.msk.f32.vlgmr.msra.gmra.mrb[8].mxu1 %vm843_vm1, %v3544_v16  ;;  %vm5385_vm13 = vcmp.eq.f32.partialorder %v3831_v2, inf  ;;  %vm662_vm14 = vcmp.eq.f32.partialorder %v3863_v8, inf  ;;  %v5389_v50 = vld [vmem:[#allocation30_spill] sm:$0xff] }
 0x110   : > { %v659_v29 = vsel %vm657_vm3, %v658_v34, %v656_v15  ;;  %v614_v24 = vsel %vm613_vm9, %v3817_v48, %v612_v40  ;;  %v591_v22 = vmul.f32 %v2813_v43, %v3831_v2  ;;  %1765 = vmatprep.mubr.f32.mxu1 %v5374_v23  ;;  %vm664_vm15 = vcmp.eq.f32.partialorder %v3863_v8, 0.0 }
 0x111   : > { %v2815_v1 = vpop.eup %2814  ;;  %v2651_v39 = vpack.c.bf16 %v659_v29, %v603_v14  ;;  %v617_v11 = vsel %vm615_vm11, %v616_v59, %v614_v24  ;;  %v670_v16 = vsel %vm669_vm4, %v3820_v13, %v668_v36  ;;  %v665_v25 = vand.u32 2147483648, %v3863_v8 }
 0x112   : > { %v673_v55 = vsel %vm671_vm5, %v672_v63, %v670_v16  ;;  %v593_v0 = vsel %vm5385_vm13, %v3831_v2, %v591_v22  ;;  %v647_v7 = vmul.f32 %v2815_v1, %v3834_v5  ;;  %vm711_vm2 = vcmp.eq.f32.partialorder %v3866_v19, inf }
 0x113   : > { %v2817_v48 = vpop.eup %2816  ;;  %2652 = vmatprep.subr.bf16.mxu0 %v2651_v39  ;;  %v2659_v26 = vpack.c.bf16 %v673_v55, %v617_v11  ;;  %v596_v41 = vsel %vm594_vm7, %v595_v35, %v593_v0  ;;  %2826 = vrsqrt.f32 %v3885_v38  ;;  %vm713_vm3 = vcmp.eq.f32.partialorder %v3866_v19, 0.0 }
 0x114   : > { %v2819_v13 = vpop.eup %2818  ;;  %v649_v57 = vsel %vm648_vm8, %v3834_v5, %v647_v7  ;;  %v605_v42 = vmul.f32 %v2817_v48, %v3860_v30  ;;  %v714_v53 = vand.u32 2147483648, %v3866_v19  ;;  %vm767_vm9 = vcmp.eq.f32.partialorder %v3872_v21, inf }
 0x115   : > { %2660 = vmatprep.subr.bf16.mxu1 %v2659_v26  ;;  %v652_v2 = vsel %vm650_vm6, %v651_v33, %v649_v57  ;;  %v661_v31 = vmul.f32 %v2819_v13, %v3863_v8  ;;  %v2821_v54 = vpop.eup %2820  ;;  %2828 = vrsqrt.f32 %v3968_v44  ;;  %v770_v47 = vand.u32 2147483648, %v3872_v21 }
 0x116   : > { %v2653_v34 = vpack.c.bf16 %v652_v2, %v596_v41  ;;  %v607_v46 = vsel %vm606_vm10, %v3860_v30, %v605_v42  ;;  %v2823_v12 = vpop.eup %2822  ;;  %v710_v51 = vmul.f32 %v2821_v54, %v3866_v19  ;;  %vm769_vm11 = vcmp.eq.f32.partialorder %v3872_v21, 0.0  ;;  %v5386_v30 = vld [vmem:[#allocation27_spill] sm:$0xff] }
 0x117   : > { %v610_v5 = vsel %vm608_vm12, %v609_v28, %v607_v46  ;;  %v663_v59 = vsel %vm662_vm14, %v3863_v8, %v661_v31  ;;  %v766_v63 = vmul.f32 %v2823_v12, %v3872_v21  ;;  %2830 = vrsqrt.f32 %v3977_v60  ;;  %v5387_v8 = vld [vmem:[#allocation28_spill] sm:$0xff] }
 0x118   : > { %2654 = vmatpush1.bf16.msra.mxu0 %v2653_v34  ;;  %v666_v10 = vsel %vm664_vm15, %v665_v25, %v663_v59  ;;  %v4214_v58 = vadd.f32 %v3985_v6, %v5386_v30  ;;  %v520_v9 = vmul.f32 %v3919_v3, %v3919_v3  ;;  %v712_v35 = vsel %vm711_vm2, %v3866_v19, %v710_v51  ;;  %v2825_v62 = vpop.eup %2824  ;;  %v5388_v3 = vld [vmem:[#allocation29_spill] sm:$0xff] }
 0x119   : > { %v2661_v56 = vpack.c.bf16 %v666_v10, %v610_v5  ;;  %v4223_v45 = vadd.f32 %v3993_v52, %v5387_v8  ;;  %v715_v49 = vsel %vm713_vm3, %v714_v53, %v712_v35  ;;  %v768_v6 = vsel %vm767_vm9, %v3872_v21, %v766_v63  ;;  %v2876_v8 = vld [vmem:[#allocation7] sm:$0xff] }
 0x11a   : > { %2832 = vrsqrt.f32 %v3991_v61  ;;  %v4233_v17 = vadd.f32 %v3996_v20, %v5388_v3  ;;  %v771_v32 = vsel %vm769_vm11, %v770_v47, %v768_v6  ;;  %vm725_vm4 = vcmp.eq.f32.partialorder %v3880_v18, inf }
 0x11b   : > { %2662 = vmatpush1.bf16.msra.mxu1 %v2661_v56  ;;  %v2655_v52 = vpack.c.bf16 %v771_v32, %v715_v49  ;;  %v724_v33 = vmul.f32 %v2825_v62, %v3880_v18  ;;  %v728_v19 = vand.u32 2147483648, %v3880_v18  ;;  %2834 = vrsqrt.f32 %v4057_v37 }
 0x11c   : > { %v4240_v21 = vadd.f32 %v520_v9, %v5389_v50  ;;  %vm727_vm5 = vcmp.eq.f32.partialorder %v3880_v18, 0.0  ;;  %2836 = vrsqrt.f32 %v4214_v58  ;;  %vm781_vm6 = vcmp.eq.f32.partialorder %v3885_v38, inf }
 0x11d   : > { %v2827_v20 = vpop.eup %2826  ;;  %2656 = vmatprep.subr.bf16.mxu0 %v2655_v52  ;;  %v726_v4 = vsel %vm725_vm4, %v3880_v18, %v724_v33  ;;  %v784_v27 = vand.u32 2147483648, %v3885_v38  ;;  %2838 = vrsqrt.f32 %v4223_v45  ;;  %vm783_vm7 = vcmp.eq.f32.partialorder %v3885_v38, 0.0 }
 0x11e   : > { %v780_v40 = vmul.f32 %v2827_v20, %v3885_v38  ;;  %vm704_vm8 = vcmp.eq.f32.partialorder %v3968_v44, inf  ;;  %v729_v14 = vsel %vm727_vm5, %v728_v19, %v726_v4  ;;  %vm706_vm10 = vcmp.eq.f32.partialorder %v3968_v44, 0.0 }
 0x11f   : > { %v2829_v43 = vpop.eup %2828  ;;  %v707_v15 = vand.u32 2147483648, %v3968_v44  ;;  %2840 = vrsqrt.f32 %v4233_v17  ;;  %vm760_vm12 = vcmp.eq.f32.partialorder %v3977_v60, inf  ;;  %vm762_vm13 = vcmp.eq.f32.partialorder %v3977_v60, 0.0 }
 0x120   : > { %v782_v18 = vsel %vm781_vm6, %v3885_v38, %v780_v40  ;;  %v703_v36 = vmul.f32 %v2829_v43, %v3968_v44  ;;  %2842 = vrsqrt.f32 %v4240_v21  ;;  %v763_v22 = vand.u32 2147483648, %v3977_v60 }
 0x121   : > { %v2831_v29 = vpop.eup %2830  ;;  %v785_v24 = vsel %vm783_vm7, %v784_v27, %v782_v18  ;;  %vm718_vm14 = vcmp.eq.f32.partialorder %v3991_v61, inf  ;;  %vm720_vm15 = vcmp.eq.f32.partialorder %v3991_v61, 0.0  ;;  %v721_v16 = vand.u32 2147483648, %v3991_v61 }
 0x122   : > { %v2663_v28 = vpack.c.bf16 %v785_v24, %v729_v14  ;;  %v705_v1 = vsel %vm704_vm8, %v3968_v44, %v703_v36  ;;  %v759_v38 = vmul.f32 %v2831_v29, %v3977_v60  ;;  %vm774_vm2 = vcmp.eq.f32.partialorder %v4057_v37, inf }
 0x123   : > { %v708_v11 = vsel %vm706_vm10, %v707_v15, %v705_v1  ;;  %vm776_vm3 = vcmp.eq.f32.partialorder %v4057_v37, 0.0  ;;  %v777_v7 = vand.u32 2147483648, %v4057_v37  ;;  %vm823_vm9 = vcmp.eq.f32.partialorder %v4214_v58, inf }
 0x124   : > { %v2833_v39 = vpop.eup %2832  ;;  %2664 = vmatprep.subr.bf16.mxu1 %v2663_v28  ;;  %v761_v55 = vsel %vm760_vm12, %v3977_v60, %v759_v38  ;;  %vm825_vm11 = vcmp.eq.f32.partialorder %v4214_v58, 0.0  ;;  %v826_v26 = vand.u32 2147483648, %v4214_v58  ;;  %vm837_vm4 = vcmp.eq.f32.partialorder %v4223_v45, inf }
 0x125   : > { %v717_v0 = vmul.f32 %v2833_v39, %v3991_v61  ;;  %v2835_v48 = vpop.eup %2834  ;;  %v764_v44 = vsel %vm762_vm13, %v763_v22, %v761_v55  ;;  %vm839_vm5 = vcmp.eq.f32.partialorder %v4223_v45, 0.0  ;;  %v840_v31 = vand.u32 2147483648, %v4223_v45 }
 0x126   : > { %v2837_v41 = vpop.eup %2836  ;;  %v2657_v25 = vpack.c.bf16 %v764_v44, %v708_v11  ;;  %v773_v57 = vmul.f32 %v2835_v48, %v4057_v37  ;;  %vm816_vm6 = vcmp.eq.f32.partialorder %v4233_v17, inf  ;;  %vm818_vm7 = vcmp.eq.f32.partialorder %v4233_v17, 0.0 }
 0x127   : > { %v719_v13 = vsel %vm718_vm14, %v3991_v61, %v717_v0  ;;  %v2839_v42 = vpop.eup %2838  ;;  %v822_v2 = vmul.f32 %v2837_v41, %v4214_v58  ;;  %v819_v34 = vand.u32 2147483648, %v4233_v17  ;;  %vm830_vm8 = vcmp.eq.f32.partialorder %v4240_v21, inf }
 0x128   : > { %v722_v60 = vsel %vm720_vm15, %v721_v16, %v719_v13  ;;  %2658 = vmatpush1.bf16.msra.mxu0 %v2657_v25  ;;  %v775_v53 = vsel %vm774_vm2, %v4057_v37, %v773_v57  ;;  %v836_v54 = vmul.f32 %v2839_v42, %v4223_v45  ;;  %v833_v5 = vand.u32 2147483648, %v4240_v21 }
 0x129   : > { %v2841_v46 = vpop.eup %2840  ;;  %v778_v61 = vsel %vm776_vm3, %v777_v7, %v775_v53  ;;  %v824_v12 = vsel %vm823_vm9, %v4214_v58, %v822_v2  ;;  %vm832_vm10 = vcmp.eq.f32.partialorder %v4240_v21, 0.0 }
 0x12a   : > { %v2843_v59 = vpop.eup %2842  ;;  %v2665_v51 = vpack.c.bf16 %v778_v61, %v722_v60  ;;  %v827_v47 = vsel %vm825_vm11, %v826_v26, %v824_v12  ;;  %v838_v10 = vsel %vm837_vm4, %v4223_v45, %v836_v54  ;;  %v815_v37 = vmul.f32 %v2841_v46, %v4233_v17 }
 0x12b   : > { %2553 = vmatprep.subr.msk.mxu0 %vm847_vm0, %v827_v47  ;;  %v841_v63 = vsel %vm839_vm5, %v840_v31, %v838_v10  ;;  %v829_v30 = vmul.f32 %v2843_v59, %v4240_v21 }
 0x12c   : > { %2666 = vmatpush1.bf16.msra.mxu1 %v2665_v51  ;;  %v817_v58 = vsel %vm816_vm6, %v4233_v17, %v815_v37 }
 0x12d   : > { %2556 = vmatprep.subr.msk.mxu1 %vm847_vm0, %v841_v63  ;;  %v820_v9 = vsel %vm818_vm7, %v819_v34, %v817_v58  ;;  %v831_v56 = vsel %vm830_vm8, %v4240_v21, %v829_v30  ;;  %v5294_v21 = vmov 0.7853982  }
 0x12e   : > { %2554 = vmatpush1.msk.msra.mxu0 %vm847_vm0, %v820_v9  ;;  %v834_v35 = vsel %vm832_vm10, %v833_v5, %v831_v56 }
 0x12f   : > { %2555 = vmatmul.mubr.msk.f32.vlgmr.msra.gmra.mrb[10].mxu0 %vm843_vm1, %v2876_v8 }
 0x130   : > { %2557 = vmatpush1.msk.msra.mxu1 %vm847_vm0, %v834_v35  ;;  %v5414_v35 = vmov 0 }
 0x131   : > { %2558 = vmatmul.mubr.msk.f32.vlgmr.msra.gmra.mrb[10].mxu1 %vm843_vm1, %v2876_v8 }
 0x19c   : > { %v4327_v45 = vpop.f32.mrb[0].mxu0 }
 0x19d   : > { %v4329_v49 = vpop.f32.mrb[1].mxu0  ;;  %vm1953_vm0 = vcmp.lt.s32.totalorder %v4327_v45, 0  ;;  %vm5292_vm1 = vcmp.lt.f32.partialorder %v4327_v45, 0.0  ;;  %v1774_v33 = vmul.f32 %v4327_v45, %v4327_v45  ;;  %v4349_v19 = vand.u32 2147483647, %v4327_v45 }
 0x19e   : > { %v4331_v6 = vpop.f32.mrb[0].mxu1  ;;  %v4352_v50 = vsel %vm1953_vm0, 3.1415927, %v5374_v23  ;;  %v4358_v20 = vsel %vm5292_vm1, 2.3561945, %v5294_v21  ;;  %v1775_v4 = vmul.f32 %v4329_v49, %v4329_v49  ;;  %vm5290_vm14 = vcmp.lt.f32.partialorder %v4329_v49, 0.0 }
 0x19f   : > { %v4333_v62 = vpop.f32.mrb[1].mxu1  ;;  %vm5291_vm12 = vcmp.lt.f32.partialorder %v4331_v6, 0.0  ;;  %vm2047_vm13 = vcmp.lt.s32.totalorder %v4331_v6, 0  ;;  %vm2000_vm15 = vcmp.lt.s32.totalorder %v4329_v49, 0  ;;  %vm1957_vm2 = vcmp.ne.f32.partialorder %v4327_v45, %v4327_v45 }
 0x1a0   : > { %5390 = vst [vmem:[#allocation21_spill] sm:$0xff] %v4333_v62  ;;  %v4367_v27 = vand.u32 2147483647, %v4331_v6  ;;  %v4372_v40 = vsel %vm5291_vm12, 2.3561945, %v5294_v21  ;;  %vm5288_vm3 = vcmp.lt.f32.partialorder %v4333_v62, 0.0  ;;  %v1776_v15 = vmul.f32 %v4331_v6, %v4331_v6 }
 0x1a1   : > { %vm2094_vm9 = vcmp.lt.s32.totalorder %v4333_v62, 0  ;;  %v4377_v43 = vsel %vm2047_vm13, 3.1415927, %v5374_v23  ;;  %v4380_v14 = vand.u32 2147483647, %v4329_v49  ;;  %vm1963_vm5 = vcmp.eq.s32.totalorder %v4349_v19, inf }
 0x1a2   : > { %v4388_v18 = vsel %vm2000_vm15, 3.1415927, %v5374_v23  ;;  %v4393_v36 = vsel %vm5290_vm14, 2.3561945, %v5294_v21  ;;  %v4396_v29 = vand.u32 2147483647, %v4333_v62  ;;  %vm2051_vm6 = vcmp.ne.f32.partialorder %v4331_v6, %v4331_v6 }
 0x1a3   : > { %v4401_v24 = vsel %vm2094_vm9, 3.1415927, %v5374_v23  ;;  %v4406_v22 = vsel %vm5288_vm3, 2.3561945, %v5294_v21  ;;  %vm2004_vm7 = vcmp.ne.f32.partialorder %v4329_v49, %v4329_v49  ;;  %v4415_v1 = vmul.f32 %v4333_v62, %v4333_v62 }
 0x1a4   : > { %5395 = vst [vmem:[#allocation31_spill] sm:$0xff] %v4396_v29  ;;  %5396 = vst [vmem:[#allocation32_spill] sm:$0xff] %v4401_v24  ;;  %vm2057_vm8 = vcmp.eq.s32.totalorder %v4367_v27, inf  ;;  %vm2010_vm13 = vcmp.eq.s32.totalorder %v4380_v14, inf }
 0x1a5   : > { %5397 = vst [vmem:[#allocation26_spill] sm:$0xff] %v4406_v22 }
 0x1a9   : > { %v4335_v3 = vpop.f32.mrb[2].mxu0  ;;  %v4337_v17 = vpop.f32.mrb[2].mxu1 }
 0x1aa   : > { %5391 = vst [vmem:[#allocation23_spill] sm:$0xff] %v4335_v3  ;;  %5392 = vst [vmem:[#allocation24_spill] sm:$0xff] %v4337_v17  ;;  %v4339_v32 = vpop.f32.mrb[3].mxu0  ;;  %v4341_v52 = vpop.f32.mrb[3].mxu1  ;;  %vm5289_vm11 = vcmp.lt.f32.partialorder %v4335_v3, 0.0  ;;  %vm2141_vm4 = vcmp.lt.s32.totalorder %v4335_v3, 0  ;;  %v4419_v38 = vmul.f32 %v4335_v3, %v4335_v3  ;;  %v4441_v57 = vmul.f32 %v4337_v17, %v4337_v17 }
 0x1ab   : > { %5393 = vst [vmem:[#allocation25_spill] sm:$0xff] %v4339_v32  ;;  %5394 = vst [vmem:[#allocation22_spill] sm:$0xff] %v4341_v52  ;;  %v4409_v28 = vand.u32 2147483647, %v4335_v3  ;;  %v4422_v39 = vsel %vm2141_vm4, 3.1415927, %v5374_v23 }
 0x1ac   : > { %5399 = vst [vmem:[#allocation28_spill] sm:$0xff] %v4422_v39  ;;  %v4427_v11 = vsel %vm5289_vm11, 2.3561945, %v5294_v21  ;;  %v4444_v42 = vand.u32 2147483647, %v4337_v17  ;;  %v5490_v30 = vld [vmem:[#allocation31_spill] sm:$0xff] }
 0x1ad   : > { %5398 = vst [vmem:[#allocation27_spill] sm:$0xff] %v4409_v28  ;;  %5400 = vst [vmem:[#allocation29_spill] sm:$0xff] %v4427_v11  ;;  %v4601_v34 = vand.u32 2147483647, %v4341_v52 }
 0x1ae   : > { %5401 = vst [vmem:[#allocation30_spill] sm:$0xff] %v4444_v42 }
 0x1af   : > { %5427 = vst [vmem:[#allocation44_spill] sm:$0xff] %v4601_v34 }
 0x1b4   : > { %v1246_v16 = vpop.f32.mrb[4].mxu0 }
 0x1b5   : > { %v1317_v55 = vpop.f32.mrb[4].mxu1  ;;  %v1782_v0 = vmul.f32 %v1246_v16, %v1246_v16  ;;  %vm1854_vm10 = vcmp.lt.f32.partialorder %v1246_v16, 1e-08  ;;  %vm1862_vm0 = vcmp.gt.f32.partialorder %v1246_v16, -1e-08  ;;  %v1248_v48 = vpop.f32.mrb[5].mxu0 }
 0x1b6   : > { %v1784_v7 = vmul.f32 %v1317_v55, %v1317_v55  ;;  %v4430_v44 = vpop.f32.mrb[5].mxu1  ;;  %vm1870_vm15 = vmand %vm1854_vm10, %vm1862_vm0  ;;  %vm1856_vm9 = vcmp.lt.f32.partialorder %v1317_v55, 1e-08  ;;  %vm1864_vm4 = vcmp.gt.f32.partialorder %v1317_v55, -1e-08  ;;  %v1783_v26 = vmul.f32 %v1248_v48, %v1248_v48 }
 0x1b7   : > { %vm1855_vm3 = vcmp.lt.f32.partialorder %v1248_v48, 1e-08  ;;  %v4433_v41 = vadd.f32 %v1782_v0, %v1774_v33  ;;  %v4435_v25 = vsel %vm1870_vm15, 1e-08, %v1246_v16  ;;  %vm1872_vm11 = vmand %vm1856_vm9, %vm1864_vm4  ;;  %vm1863_vm14 = vcmp.gt.f32.partialorder %v1248_v48, -1e-08 }
 0x1b8   : > { %v4437_v13 = vadd.f32 %v1784_v7, %v1776_v15  ;;  %v4447_v60 = vand.u32 2147483647, %v4435_v25  ;;  %vm1958_vm10 = vcmp.ne.f32.partialorder %v4435_v25, %v4435_v25  ;;  %vm1871_vm0 = vmand %vm1855_vm3, %vm1863_vm14  ;;  %vm2235_vm15 = vcmp.lt.s32.totalorder %v4337_v17, 0 }
 0x1b9   : > { %vm4455_vm9 = vmor %vm1957_vm2, %vm1958_vm10  ;;  %v4459_v31 = vsel %vm1872_vm11, 1e-08, %v1317_v55  ;;  %v4461_v53 = vadd.f32 %v1783_v26, %v1775_v4  ;;  %v4463_v54 = vsel %vm1871_vm0, 1e-08, %v1248_v48  ;;  %vm2098_vm3 = vcmp.ne.f32.partialorder %v4333_v62, %v4333_v62 }
 0x1ba   : > { %v1926_v46 = vmax.f32 %v4349_v19, %v4447_v60  ;;  %vm1964_vm2 = vcmp.eq.s32.totalorder %v4447_v60, inf  ;;  %vm5293_vm11 = vcmp.lt.f32.partialorder %v4337_v17, 0.0  ;;  %v4482_v12 = vand.u32 2147483647, %v4459_v31 }
 0x1bb   : > { %vm4477_vm4 = vmand %vm1963_vm5, %vm1964_vm2  ;;  %vm2052_vm10 = vcmp.ne.f32.partialorder %v4459_v31, %v4459_v31  ;;  %v1785_v5 = vmul.f32 %v4430_v44, %v4430_v44  ;;  %v4489_v59 = vsel %vm2235_vm15, 3.1415927, %v5374_v23  ;;  %v4499_v47 = vand.u32 2147483647, %v4463_v54 }
 0x1bc   : > { %5406 = vst [vmem:[#allocation33_spill] sm:$0xff] %v4489_v59  ;;  %2844 = vrcp.f32 %v1926_v46  ;;  %vm4494_vm5 = vmor %vm2051_vm6, %vm2052_vm10  ;;  %vm2005_vm0 = vcmp.ne.f32.partialorder %v4463_v54, %v4463_v54  ;;  %v2020_v37 = vmax.f32 %v4367_v27, %v4482_v12  ;;  %vm2058_vm15 = vcmp.eq.s32.totalorder %v4482_v12, inf }
 0x1bd   : > { %vm4514_vm10 = vmor %vm2004_vm7, %vm2005_vm0  ;;  %v1973_v9 = vmax.f32 %v4380_v14, %v4499_v47  ;;  %vm2011_vm0 = vcmp.eq.s32.totalorder %v4499_v47, inf  ;;  %v4536_v56 = vsel %vm5293_vm11, 2.3561945, %v5294_v21  ;;  %v4545_v8 = vadd.f32 %v1785_v5, %v4415_v1 }
 0x1be   : > { %vm4522_vm1 = vmand %vm2057_vm8, %vm2058_vm15  ;;  %5413 = vst [vmem:[#allocation34_spill] sm:$0xff] %v4536_v56  ;;  %2846 = vrcp.f32 %v2020_v37  ;;  %vm1857_vm15 = vcmp.lt.f32.partialorder %v4430_v44, 1e-08  ;;  %vm1865_vm11 = vcmp.gt.f32.partialorder %v4430_v44, -1e-08  ;;  %vm2239_vm2 = vcmp.ne.f32.partialorder %v4337_v17, %v4337_v17 }
 0x1bf   : > { %vm4540_vm8 = vmand %vm2010_vm13, %vm2011_vm0  ;;  %5417 = vst [vmem:[#allocation36_spill] sm:$0xff] %v4545_v8  ;;  %v1388_v33 = vpop.f32.mrb[6].mxu0  ;;  %2848 = vrcp.f32 %v1973_v9  ;;  %v1779_v1 = vmul.f32 %v4339_v32, %v4339_v32  ;;  %v4568_v46 = vand.u32 2147483647, %v4339_v32  ;;  %v1781_v5 = vmul.f32 %v4341_v52, %v4341_v52 }
 0x1c0   : > { %v5415_v35 = vsel %vm4540_vm8, 4294967295, %v5414_v35  ;;  %v1459_v4 = vpop.f32.mrb[6].mxu1  ;;  %v1786_v15 = vmul.f32 %v1388_v33, %v1388_v33  ;;  %vm1858_vm6 = vcmp.lt.f32.partialorder %v1388_v33, 1e-08  ;;  %v4550_v16 = vpop.f32.mrb[7].mxu0  ;;  %vm1873_vm13 = vmand %vm1857_vm15, %vm1865_vm11  ;;  %vm2245_vm11 = vcmp.eq.s32.totalorder %v4444_v42, inf }
 0x1c1   : > { %5416 = vst [vmem:[#allocation35_spill] sm:$0xff] %v5415_v35  ;;  %v4552_v55 = vpop.f32.mrb[7].mxu1  ;;  %vm1866_vm0 = vcmp.gt.f32.partialorder %v1388_v33, -1e-08  ;;  %v1788_v0 = vmul.f32 %v1459_v4, %v1459_v4  ;;  %vm1860_vm14 = vcmp.lt.f32.partialorder %v1459_v4, 1e-08  ;;  %v1787_v26 = vmul.f32 %v4550_v16, %v4550_v16 }
 0x1c2   : > { %vm1868_vm12 = vcmp.gt.f32.partialorder %v1459_v4, -1e-08  ;;  %v4559_v7 = vsel %vm1873_vm13, 1e-08, %v4430_v44  ;;  %v4562_v48 = vadd.f32 %v1786_v15, %v4419_v38  ;;  %vm1874_vm7 = vmand %vm1858_vm6, %vm1866_vm0  ;;  %5419 = vst [vmem:[#allocation38_spill] sm:$0xff] %v4568_v46  ;;  %v5421_v38 = vmov 0 }
 0x1c3   : > { %v4573_v37 = vand.u32 2147483647, %v4559_v7  ;;  %vm2099_vm15 = vcmp.ne.f32.partialorder %v4559_v7, %v4559_v7  ;;  %vm1876_vm13 = vmand %vm1860_vm14, %vm1868_vm12  ;;  %v4584_v44 = vsel %vm1874_vm7, 1e-08, %v1388_v33  ;;  %v4587_v9 = vadd.f32 %v1788_v0, %v4441_v57 }
 0x1c4   : > { %5418 = vst [vmem:[#allocation37_spill] sm:$0xff] %v4562_v48  ;;  %vm4580_vm6 = vmor %vm2098_vm3, %vm2099_vm15  ;;  %v4589_v15 = vsel %vm1876_vm13, 1e-08, %v1459_v4  ;;  %v4591_v21 = vadd.f32 %v1787_v26, %v1779_v1  ;;  %vm5428_vm3 = vcmp.eq.s32.totalorder %v4396_v29, inf  ;;  %v5429_v4 = vmov 0 }
 0x1c5   : > { %5420 = vst [vmem:[#allocation39_spill] sm:$0xff] %v4573_v37  ;;  %v5422_v38 = vsel %vm4580_vm6, 4294967295, %v5421_v38  ;;  %5424 = vst [vmem:[#allocation41_spill] sm:$0xff] %v4587_v9  ;;  %v2067_v10 = vmax.f32 %v4396_v29, %v4573_v37  ;;  %vm2105_vm14 = vcmp.eq.s32.totalorder %v4573_v37, inf  ;;  %v4611_v0 = vand.u32 2147483647, %v4584_v44 }
 0x1c6   : > { %5423 = vst [vmem:[#allocation40_spill] sm:$0xff] %v5422_v38  ;;  %5425 = vst [vmem:[#allocation42_spill] sm:$0xff] %v4589_v15  ;;  %v2845_v33 = vpop.eup %2844  ;;  %vm2146_vm0 = vcmp.ne.f32.partialorder %v4584_v44, %v4584_v44  ;;  %v5433_v1 = vmin.f32 %v4349_v19, %v4447_v60  ;;  %vm5434_vm15 = vcmp.ne.f32.partialorder %v4335_v3, %v4335_v3  ;;  %v5435_v57 = vmov 0 }
 0x1c7   : > { %5426 = vst [vmem:[#allocation43_spill] sm:$0xff] %v4591_v21  ;;  %vm4606_vm7 = vmand %vm5428_vm3, %vm2105_vm14  ;;  %2850 = vrcp.f32 %v2067_v10  ;;  %v4628_v58 = vand.u32 2147483647, %v4589_v15  ;;  %v2114_v10 = vmax.f32 %v4409_v28, %v4611_v0  ;;  %vm5439_vm12 = vcmp.eq.s32.totalorder %v4409_v28, inf }
 0x1c8   : > { %v5430_v4 = vsel %vm4606_vm7, 4294967295, %v5429_v4  ;;  %5432 = vst [vmem:[#allocation46_spill] sm:$0xff] %v4611_v0  ;;  %v4618_v26 = vmul.f32 %v2845_v33, %v5433_v1  ;;  %vm4623_vm13 = vmor %vm5434_vm15, %vm2146_vm0  ;;  %vm2152_vm15 = vcmp.eq.s32.totalorder %v4611_v0, inf  ;;  %v2847_v1 = vpop.eup %2846  ;;  %v5440_v9 = vmov 0 }
 0x1c9   : > { %5431 = vst [vmem:[#allocation45_spill] sm:$0xff] %v5430_v4  ;;  %v5436_v57 = vsel %vm4623_vm13, 4294967295, %v5435_v57  ;;  %5438 = vst [vmem:[#allocation48_spill] sm:$0xff] %v4628_v58  ;;  %v2208_v23 = vmax.f32 %v4444_v42, %v4628_v58  ;;  %v2849_v48 = vpop.eup %2848  ;;  %v5443_v8 = vmin.f32 %v4367_v27, %v4482_v12  ;;  %2852 = vrcp.f32 %v2114_v10 }
 0x1ca   : > { %5437 = vst [vmem:[#allocation47_spill] sm:$0xff] %v5436_v57  ;;  %v4642_v21 = vmul.f32 %v4618_v26, %v4618_v26  ;;  %vm4646_vm14 = vmand %vm5439_vm12, %vm2152_vm15  ;;  %vm2240_vm12 = vcmp.ne.f32.partialorder %v4589_v15, %v4589_v15  ;;  %vm2246_vm15 = vcmp.eq.s32.totalorder %v4628_v58, inf  ;;  %vm1867_vm13 = vcmp.gt.f32.partialorder %v4550_v16, -1e-08 }
 0x1cb   : > { %v5441_v9 = vsel %vm4646_vm14, 4294967295, %v5440_v9  ;;  %v4660_v56 = vmul.f32 %v2847_v1, %v5443_v8  ;;  %2854 = vrcp.f32 %v2208_v23  ;;  %vm4675_vm0 = vmor %vm2239_vm2, %vm2240_vm12  ;;  %v5445_v8 = vmov 0 }
 0x1cc   : > { %5442 = vst [vmem:[#allocation49_spill] sm:$0xff] %v5441_v9  ;;  %v1930_v33 = vmul.f32 0.002785687, %v4642_v21  ;;  %v5444_v9 = vmin.f32 %v4380_v14, %v4499_v47  ;;  %v5446_v8 = vsel %vm4675_vm0, 4294967295, %v5445_v8  ;;  %vm4687_vm14 = vmand %vm2245_vm11, %vm2246_vm15  ;;  %v1789_v23 = vmul.f32 %v4552_v55, %v4552_v55 }
 0x1cd   : > { %5447 = vst [vmem:[#allocation50_spill] sm:$0xff] %v5446_v8  ;;  %v4683_v10 = vmul.f32 %v4660_v56, %v4660_v56  ;;  %vm1861_vm2 = vcmp.lt.f32.partialorder %v4552_v55, 1e-08  ;;  %vm5451_vm12 = vcmp.lt.f32.partialorder %v4550_v16, 1e-08  ;;  %2856 = vrsqrt.f32 %v4433_v41 }
 0x1ce   : > { %v4670_v11 = vmul.f32 %v2849_v48, %v5444_v9  ;;  %v5448_v48 = vmov 0  ;;  %v1931_v9 = vadd.f32 -0.015866, %v1930_v33  ;;  %vm1875_vm3 = vmand %vm5451_vm12, %vm1867_vm13  ;;  %vm1869_vm11 = vcmp.gt.f32.partialorder %v4552_v55, -1e-08 }
 0x1cf   : > { %v5449_v48 = vsel %vm4687_vm14, 4294967295, %v5448_v48  ;;  %v2024_v59 = vmul.f32 0.002785687, %v4683_v10  ;;  %v4706_v8 = vsel %vm1875_vm3, 1e-08, %v4550_v16  ;;  %v4708_v17 = vadd.f32 %v1789_v23, %v1781_v5  ;;  %vm1877_vm15 = vmand %vm1861_vm2, %vm1869_vm11 }
 0x1d0   : > { %5450 = vst [vmem:[#allocation51_spill] sm:$0xff] %v5449_v48  ;;  %v4697_v1 = vmul.f32 %v4670_v11, %v4670_v11  ;;  %5452 = vst [vmem:[#allocation52_spill] sm:$0xff] %v4706_v8  ;;  %v1932_v33 = vmul.f32 %v1931_v9, %v4642_v21  ;;  %v4714_v3 = vand.u32 2147483647, %v4706_v8  ;;  %vm2193_vm13 = vcmp.ne.f32.partialorder %v4706_v8, %v4706_v8 }
 0x1d1   : > { %5453 = vst [vmem:[#allocation53_spill] sm:$0xff] %v4708_v17  ;;  %v2025_v4 = vadd.f32 -0.015866, %v2024_v59  ;;  %v4720_v16 = vsel %vm1877_vm15, 1e-08, %v4552_v55  ;;  %v2851_v5 = vpop.eup %2850  ;;  %vm5456_vm3 = vcmp.ne.f32.partialorder %v4339_v32, %v4339_v32  ;;  %v5457_v59 = vmov 0 }
 0x1d2   : > { %v1977_v57 = vmul.f32 0.002785687, %v4697_v1  ;;  %5454 = vst [vmem:[#allocation54_spill] sm:$0xff] %v4714_v3  ;;  %5455 = vst [vmem:[#allocation55_spill] sm:$0xff] %v4720_v16  ;;  %v1933_v23 = vadd.f32 0.04247222, %v1932_v33  ;;  %v2160_v9 = vmin.f32 %v4568_v46, %v4714_v3  ;;  %v2161_v39 = vmax.f32 %v4568_v46, %v4714_v3 }
 0x1d3   : > { %vm4729_vm2 = vmor %vm5456_vm3, %vm2193_vm13  ;;  %vm2292_vm12 = vcmp.eq.s32.totalorder %v4601_v34, inf  ;;  %v2026_v55 = vmul.f32 %v2025_v4, %v4683_v10  ;;  %vm2199_vm15 = vcmp.eq.s32.totalorder %v4714_v3, inf  ;;  %vm5461_vm13 = vcmp.eq.s32.totalorder %v4568_v46, inf }
 0x1d4   : > { %v1978_v48 = vadd.f32 -0.015866, %v1977_v57  ;;  %v5458_v59 = vsel %vm4729_vm2, 4294967295, %v5457_v59  ;;  %v5460_v57 = vmin.f32 %v4396_v29, %v4573_v37  ;;  %v1934_v22 = vmul.f32 %v1933_v23, %v4642_v21  ;;  %vm4747_vm3 = vmand %vm5461_vm13, %vm2199_vm15 }
 0x1d5   : > { %5459 = vst [vmem:[#allocation56_spill] sm:$0xff] %v5458_v59  ;;  %2858 = vrcp.f32 %v2161_v39  ;;  %v5462_v59 = vmov 0  ;;  %v4752_v4 = vand.u32 2147483647, %v4720_v16  ;;  %vm2287_vm11 = vcmp.ne.f32.partialorder %v4720_v16, %v4720_v16 }
 0x1d6   : > { %v4738_v33 = vmul.f32 %v2851_v5, %v5460_v57  ;;  %v1979_v17 = vmul.f32 %v1978_v48, %v4697_v1  ;;  %v5463_v59 = vsel %vm4747_vm3, 4294967295, %v5462_v59  ;;  %v2853_v5 = vpop.eup %2852  ;;  %v2027_v57 = vadd.f32 0.04247222, %v2026_v55 }
 0x1d7   : > { %5464 = vst [vmem:[#allocation57_spill] sm:$0xff] %v5463_v59  ;;  %v2855_v39 = vpop.eup %2854  ;;  %v1935_v48 = vadd.f32 -0.074975304, %v1934_v22  ;;  %v5465_v59 = vmin.f32 %v4409_v28, %v4611_v0  ;;  %vm5466_vm15 = vcmp.ne.f32.partialorder %v4341_v52, %v4341_v52  ;;  %v5467_v32 = vmov 0 }
 0x1d8   : > { %v4756_v8 = vmul.f32 %v4738_v33, %v4738_v33  ;;  %v1980_v46 = vadd.f32 0.04247222, %v1979_v17  ;;  %vm4771_vm13 = vmor %vm5466_vm15, %vm2287_vm11  ;;  %v2028_v23 = vmul.f32 %v2027_v57, %v4683_v10  ;;  %v5470_v17 = vmin.f32 %v4444_v42, %v4628_v58 }
 0x1d9   : > { %v4764_v3 = vmul.f32 %v2853_v5, %v5465_v59  ;;  %v5468_v32 = vsel %vm4771_vm13, 4294967295, %v5467_v32  ;;  %v2255_v59 = vmax.f32 %v4601_v34, %v4752_v4  ;;  %v2857_v5 = vpop.eup %2856  ;;  %v1936_v55 = vmul.f32 %v1935_v48, %v4642_v21 }
 0x1da   : > { %5469 = vst [vmem:[#allocation58_spill] sm:$0xff] %v5468_v32  ;;  %v2071_v22 = vmul.f32 0.002785687, %v4756_v8  ;;  %v4780_v16 = vmul.f32 %v2855_v39, %v5470_v17  ;;  %v1981_v52 = vmul.f32 %v1980_v46, %v4697_v1  ;;  %v2029_v57 = vadd.f32 -0.074975304, %v2028_v23 }
 0x1db   : > { %v4788_v32 = vmul.f32 %v4764_v3, %v4764_v3  ;;  %2860 = vrcp.f32 %v2255_v59  ;;  %v1937_v17 = vadd.f32 0.1064488, %v1936_v55  ;;  %v1799_v46 = vmul.f32 %v2857_v5, %v4433_v41 }
 0x1dc   : > { %5471 = vst [vmem:[#allocation59_spill] sm:$0xff] %v4780_v16  ;;  %v2072_v38 = vadd.f32 -0.015866, %v2071_v22  ;;  %v4794_v39 = vmul.f32 %v4780_v16, %v4780_v16  ;;  %v1982_v42 = vadd.f32 -0.074975304, %v1981_v52  ;;  %v2030_v58 = vmul.f32 %v2029_v57, %v4683_v10 }
 0x1dd   : > { %v2118_v48 = vmul.f32 0.002785687, %v4788_v32  ;;  %vm2293_vm15 = vcmp.eq.s32.totalorder %v4752_v4, inf  ;;  %v1938_v23 = vmul.f32 %v1937_v17, %v4642_v21  ;;  %v5472_v52 = vmov 0 }
 0x1de   : > { %v2073_v24 = vmul.f32 %v2072_v38, %v4756_v8  ;;  %v2212_v28 = vmul.f32 0.002785687, %v4794_v39  ;;  %v1983_v22 = vmul.f32 %v1982_v42, %v4697_v1  ;;  %vm4806_vm11 = vmand %vm2292_vm12, %vm2293_vm15  ;;  %vm1800_vm13 = vcmp.eq.f32.partialorder %v4433_v41, inf }
 0x1df   : > { %v2119_v0 = vadd.f32 -0.015866, %v2118_v48  ;;  %v5473_v52 = vsel %vm4806_vm11, 4294967295, %v5472_v52  ;;  %v2031_v55 = vadd.f32 0.1064488, %v2030_v58  ;;  %v1801_v5 = vsel %vm1800_vm13, %v4433_v41, %v1799_v46  ;;  %v2859_v57 = vpop.eup %2858  ;;  %v1554_v46 = vpop.f32.mrb[8].mxu0 }
 0x1e0   : > { %5474 = vst [vmem:[#allocation60_spill] sm:$0xff] %v5473_v52  ;;  %v2074_v59 = vadd.f32 0.04247222, %v2073_v24  ;;  %v2213_v38 = vadd.f32 -0.015866, %v2212_v28  ;;  %vm1802_vm3 = vcmp.eq.f32.partialorder %v4433_v41, 0.0  ;;  %v4817_v16 = vmul.f32 %v2859_v57, %v2160_v9 }
 0x1e1   : > { %v1939_v62 = vadd.f32 -0.14207031, %v1938_v23  ;;  %v1984_v15 = vadd.f32 0.1064488, %v1983_v22  ;;  %v2120_v17 = vmul.f32 %v2119_v0, %v4788_v32  ;;  %v2032_v42 = vmul.f32 %v2031_v55, %v4683_v10 }
 0x1e2   : > { %v2075_v48 = vmul.f32 %v2074_v59, %v4756_v8  ;;  %v2214_v52 = vmul.f32 %v2213_v38, %v4794_v39  ;;  %5475 = vst [vmem:[#allocation61_spill] sm:$0xff] %v4817_v16  ;;  %v1803_v23 = vand.u32 2147483648, %v4433_v41  ;;  %v4824_v55 = vmul.f32 %v4817_v16, %v4817_v16  ;;  %v4829_v38 = vpop.f32.mrb[9].mxu0 }
 0x1e3   : > { %v1940_v24 = vmul.f32 %v1939_v62, %v4642_v21  ;;  %v1985_v28 = vmul.f32 %v1984_v15, %v4697_v1  ;;  %v2121_v58 = vadd.f32 0.04247222, %v2120_v17  ;;  %v2033_v22 = vadd.f32 -0.14207031, %v2032_v42  ;;  %5476 = vst [vmem:[#allocation62_spill] sm:$0xff] %v4829_v38 }
 0x1e4   : > { %v2076_v0 = vadd.f32 -0.074975304, %v2075_v48  ;;  %v2215_v29 = vadd.f32 0.04247222, %v2214_v52  ;;  %v1804_v62 = vsel %vm1802_vm3, %v1803_v23, %v1801_v5  ;;  %v2165_v42 = vmul.f32 0.002785687, %v4824_v55 }
 0x1e5   : > { %v1941_v59 = vadd.f32 0.19993454, %v1940_v24  ;;  %v1986_v37 = vadd.f32 -0.14207031, %v1985_v28  ;;  %v2122_v9 = vmul.f32 %v2121_v58, %v4788_v32  ;;  %v2861_v15 = vpop.eup %2860  ;;  %v2034_v57 = vmul.f32 %v2033_v22, %v4683_v10  ;;  %v4835_v48 = vpop.f32.mrb[8].mxu1 }
 0x1e6   : > { %v2077_v17 = vmul.f32 %v2076_v0, %v4756_v8  ;;  %v2216_v52 = vmul.f32 %v2215_v29, %v4794_v39  ;;  %5477 = vst [vmem:[#allocation63_spill] sm:$0xff] %v4835_v48  ;;  %v5478_v41 = vmin.f32 %v4601_v34, %v4752_v4  ;;  %v4844_v23 = vpop.f32.mrb[9].mxu1  ;;  %v4846_v29 = vadd.f32 %v1804_v62, %v1554_v46 }
 0x1e7   : > { %v1942_v24 = vmul.f32 %v1941_v59, %v4642_v21  ;;  %v1987_v28 = vmul.f32 %v1986_v37, %v4697_v1  ;;  %v2123_v58 = vadd.f32 -0.074975304, %v2122_v9  ;;  %v2035_v22 = vadd.f32 0.19993454, %v2034_v57 }
 0x1e8   : > { %v4842_v5 = vmul.f32 %v2861_v15, %v5478_v41  ;;  %v2078_v0 = vadd.f32 0.1064488, %v2077_v17  ;;  %v2217_v38 = vadd.f32 -0.074975304, %v2216_v52  ;;  %v2166_v59 = vadd.f32 -0.015866, %v2165_v42 }
 0x1e9   : > { %v1943_v16 = vadd.f32 -0.33333147, %v1942_v24  ;;  %v1988_v35 = vadd.f32 0.19993454, %v1987_v28  ;;  %v2124_v48 = vmul.f32 %v2123_v58, %v4788_v32  ;;  %v2036_v37 = vmul.f32 %v2035_v22, %v4683_v10 }
 0x1ea   : > { %v2079_v9 = vmul.f32 %v2078_v0, %v4756_v8  ;;  %v2218_v34 = vmul.f32 %v2217_v38, %v4794_v39  ;;  %v4854_v15 = vmul.f32 %v4842_v5, %v4842_v5  ;;  %v2167_v17 = vmul.f32 %v2166_v59, %v4824_v55 }
 0x1eb   : > { %v1944_v57 = vmul.f32 %v1943_v16, %v4642_v21  ;;  %v1989_v46 = vmul.f32 %v1988_v35, %v4697_v1  ;;  %v2125_v62 = vadd.f32 0.1064488, %v2124_v48  ;;  %v2037_v52 = vadd.f32 -0.33333147, %v2036_v37 }
 0x1ec   : > { %v2080_v24 = vadd.f32 -0.14207031, %v2079_v9  ;;  %v2219_v42 = vadd.f32 0.1064488, %v2218_v34  ;;  %2862 = vrsqrt.f32 %v4437_v13  ;;  %v2168_v41 = vadd.f32 0.04247222, %v2167_v17 }
 0x1ed   : > { %v1945_v28 = vmul.f32 %v1944_v57, %v4618_v26  ;;  %v1990_v58 = vadd.f32 -0.33333147, %v1989_v46  ;;  %v2126_v38 = vmul.f32 %v2125_v62, %v4788_v32  ;;  %vm1955_vm12 = vcmp.eq.f32.partialorder %v4435_v25, 0.0 }
 0x1ee   : > { %v2038_v21 = vmul.f32 %v2037_v52, %v4683_v10  ;;  %v2081_v35 = vmul.f32 %v2080_v24, %v4756_v8  ;;  %v2220_v16 = vmul.f32 %v2219_v42, %v4794_v39  ;;  %v2259_v48 = vmul.f32 0.002785687, %v4854_v15 }
 0x1ef   : > { %v1946_v34 = vadd.f32 %v1945_v28, %v4618_v26  ;;  %v1991_v22 = vmul.f32 %v1990_v58, %v4697_v1  ;;  %v2127_v0 = vadd.f32 -0.14207031, %v2126_v38  ;;  %v2169_v59 = vmul.f32 %v2168_v41, %v4824_v55 }
 0x1f0   : > { %v2039_v37 = vmul.f32 %v2038_v21, %v4660_v56  ;;  %v2082_v9 = vadd.f32 0.19993454, %v2081_v35  ;;  %v2221_v57 = vadd.f32 -0.14207031, %v2220_v16  ;;  %v2260_v46 = vadd.f32 -0.015866, %v2259_v48 }
 0x1f1   : > { %v1948_v62 = vsub.f32 1.5707964, %v1946_v34  ;;  %v1992_v10 = vmul.f32 %v1991_v22, %v4670_v11  ;;  %v2128_v17 = vmul.f32 %v2127_v0, %v4788_v32  ;;  %v2170_v52 = vadd.f32 -0.074975304, %v2169_v59 }
 0x1f2   : > { %v2040_v26 = vadd.f32 %v2039_v37, %v4660_v56  ;;  %v2083_v1 = vmul.f32 %v2082_v9, %v4756_v8  ;;  %v2222_v24 = vmul.f32 %v2221_v57, %v4794_v39  ;;  %v2261_v42 = vmul.f32 %v2260_v46, %v4854_v15 }
 0x1f3   : > { %vm5479_vm15 = vcmp.gt.f32.partialorder %v4447_v60, %v4349_v19  ;;  %v1993_v58 = vadd.f32 %v1992_v10, %v4670_v11  ;;  %v2129_v38 = vadd.f32 0.19993454, %v2128_v17  ;;  %v2171_v41 = vmul.f32 %v2170_v52, %v4824_v55 }
 0x1f4   : > { %v1949_v28 = vsel %vm5479_vm15, %v1948_v62, %v1946_v34  ;;  %v2042_v35 = vsub.f32 1.5707964, %v2040_v26  ;;  %v2084_v56 = vadd.f32 -0.33333147, %v2083_v1  ;;  %2864 = vrsqrt.f32 %v4461_v53 }
 0x1f5   : > { %v1951_v21 = vsub.f32 3.1415927, %v1949_v28  ;;  %v1995_v16 = vsub.f32 1.5707964, %v1993_v58  ;;  %v2130_v48 = vmul.f32 %v2129_v38, %v4788_v32  ;;  %v2223_v22 = vadd.f32 0.19993454, %v2222_v24 }
 0x1f6   : > { %v2172_v0 = vadd.f32 0.1064488, %v2171_v41  ;;  %v2863_v59 = vpop.eup %2862  ;;  %vm5480_vm13 = vcmp.lt.f32.partialorder %v4327_v45, 0.0  ;;  %vm5481_vm15 = vcmp.gt.f32.partialorder %v4482_v12, %v4367_v27  ;;  %v2085_v60 = vmul.f32 %v2084_v56, %v4756_v8  ;;  %v5489_v38 = vld [vmem:[#allocation39_spill] sm:$0xff] }
 0x1f7   : > { %v1952_v19 = vsel %vm5480_vm13, %v1951_v21, %v1949_v28  ;;  %v2043_v11 = vsel %vm5481_vm15, %v2042_v35, %v2040_v26  ;;  %v2262_v34 = vadd.f32 0.04247222, %v2261_v42  ;;  %vm5482_vm3 = vcmp.gt.f32.partialorder %v4499_v47, %v4380_v14 }
 0x1f8   : > { %v1956_v37 = vsel %vm1955_vm12, %v4352_v50, %v1952_v19  ;;  %v2045_v9 = vsub.f32 3.1415927, %v2043_v11  ;;  %v1996_v57 = vsel %vm5482_vm3, %v1995_v16, %v1993_v58  ;;  %v2131_v46 = vadd.f32 -0.33333147, %v2130_v48 }
 0x1f9   : > { %v1960_v45 = vsel %vm4455_vm9, nan, %v1956_v37  ;;  %v1998_v62 = vsub.f32 3.1415927, %v1996_v57  ;;  %v2086_v27 = vmul.f32 %v2085_v60, %v4738_v33  ;;  %v2224_v12 = vmul.f32 %v2223_v22, %v4794_v39  ;;  %v5495_v22 = vld [vmem:[#allocation42_spill] sm:$0xff]  ;;  %v5496_v60 = vld [vmem:[#allocation21_spill] sm:$0xff]  ;;  %v5499_v37 = vld [vmem:[#allocation27_spill] sm:$0xff] }
 0x1fa   : > { %v1966_v8 = vsel %vm4477_vm4, %v4358_v20, %v1960_v45  ;;  %vm5483_vm12 = vcmp.lt.f32.partialorder %v4331_v6, 0.0  ;;  %vm2096_vm13 = vcmp.eq.f32.partialorder %v4559_v7, 0.0  ;;  %v2132_v14 = vmul.f32 %v2131_v46, %v4788_v32  ;;  %v5501_v46 = vld [vmem:[#allocation32_spill] sm:$0xff] }
 0x1fb   : > { %v2046_v50 = vsel %vm5483_vm12, %v2045_v9, %v2043_v11  ;;  %v2173_v47 = vmul.f32 %v2172_v0, %v4824_v55  ;;  %v1967_v2 = vand.u32 2147483647, %v1966_v8  ;;  %vm5484_vm9 = vcmp.eq.f32.partialorder %v4459_v31, 0.0 }
 0x1fc   : > { %v2050_v10 = vsel %vm5484_vm9, %v4377_v43, %v2046_v50  ;;  %vm5485_vm3 = vcmp.lt.f32.partialorder %v4329_v49, 0.0  ;;  %v2087_v61 = vadd.f32 %v2086_v27, %v4738_v33  ;;  %vm5486_vm4 = vcmp.eq.f32.partialorder %v4463_v54, 0.0 }
 0x1fd   : > { %v1999_v17 = vsel %vm5485_vm3, %v1998_v62, %v1996_v57  ;;  %v2054_v6 = vsel %vm4494_vm5, nan, %v2050_v10  ;;  %v2133_v32 = vmul.f32 %v2132_v14, %v4764_v3  ;;  %v2225_v52 = vadd.f32 -0.33333147, %v2224_v12  ;;  %v5503_v14 = vld [vmem:[#allocation26_spill] sm:$0xff] }
 0x1fe   : > { %v2003_v20 = vsel %vm5486_vm4, %v4388_v18, %v1999_v17  ;;  %v5487_v26 = vand.u32 2147483648, %v4435_v25  ;;  %v2060_v49 = vsel %vm4522_vm1, %v4372_v40, %v2054_v6  ;;  %v2089_v51 = vsub.f32 1.5707964, %v2087_v61  ;;  %v2865_v28 = vpop.eup %2864 }
 0x1ff   : > { %v2007_v43 = vsel %vm4514_vm10, nan, %v2003_v20  ;;  %vm2143_vm5 = vcmp.eq.f32.partialorder %v4584_v44, 0.0  ;;  %v2061_v33 = vand.u32 2147483647, %v2060_v49  ;;  %v2134_v42 = vadd.f32 %v2133_v32, %v4764_v3  ;;  %v5507_v20 = vld [vmem:[#allocation28_spill] sm:$0xff] }
 0x200   : > { %v4924_v1 = vor.u32 %v5487_v26, %v1967_v2  ;;  %v2013_v24 = vsel %vm4540_vm8, %v4393_v36, %v2007_v43  ;;  %v2226_v25 = vmul.f32 %v2225_v52, %v4794_v39  ;;  %vm5491_vm1 = vcmp.gt.f32.partialorder %v5489_v38, %v5490_v30  ;;  %v5493_v36 = vld [vmem:[#allocation59_spill] sm:$0xff]  ;;  %v5508_v52 = vld [vmem:[#allocation48_spill] sm:$0xff]  ;;  %v5509_v26 = vld [vmem:[#allocation30_spill] sm:$0xff] }
 0x201   : > { %v2014_v58 = vand.u32 2147483647, %v2013_v24  ;;  %v2090_v40 = vsel %vm5491_vm1, %v2089_v51, %v2087_v61  ;;  %v2174_v63 = vadd.f32 -0.14207031, %v2173_v47  ;;  %v2263_v41 = vmul.f32 %v2262_v34, %v4854_v15  ;;  %v5498_v34 = vld [vmem:[#allocation46_spill] sm:$0xff]  ;;  %v5505_v2 = vld [vmem:[#allocation23_spill] sm:$0xff] }
 0x202   : > { %v5492_v21 = vand.u32 2147483648, %v4459_v31  ;;  %v2092_v56 = vsub.f32 3.1415927, %v2090_v40  ;;  %v2136_v16 = vsub.f32 1.5707964, %v2134_v42  ;;  %v2227_v48 = vmul.f32 %v2226_v25, %v5493_v36  ;;  %v5511_v51 = vld [vmem:[#allocation25_spill] sm:$0xff] }
 0x203   : > { %v5494_v3 = vand.u32 2147483648, %v4463_v54  ;;  %vm2237_vm10 = vcmp.eq.f32.partialorder %v5495_v22, 0.0  ;;  %v2175_v0 = vmul.f32 %v2174_v63, %v4824_v55  ;;  %v2264_v19 = vadd.f32 -0.074975304, %v2263_v41  ;;  %v5516_v63 = vld [vmem:[#allocation49_spill] sm:$0xff] }
 0x204   : > { %v4943_v35 = vor.u32 %v5492_v21, %v2061_v33  ;;  %v4953_v11 = vmul.f32 0.5, %v4846_v29  ;;  %vm5497_vm8 = vcmp.lt.f32.partialorder %v5496_v60, 0.0  ;;  %vm5500_vm15 = vcmp.gt.f32.partialorder %v5498_v34, %v5499_v37  ;;  %v5512_v33 = vld [vmem:[#allocation47_spill] sm:$0xff]  ;;  %v5520_v60 = vld [vmem:[#allocation33_spill] sm:$0xff] }
 0x205   : > { %v4948_v39 = vor.u32 %v5494_v3, %v2014_v58  ;;  %v2093_v31 = vsel %vm5497_vm8, %v2092_v56, %v2090_v40  ;;  %v2137_v9 = vsel %vm5500_vm15, %v2136_v16, %v2134_v42  ;;  %v2228_v57 = vadd.f32 %v2227_v48, %v5493_v36  ;;  %v4987_v58 = vpop.f32.mrb[10].mxu0  ;;  %v5515_v40 = vld [vmem:[#allocation29_spill] sm:$0xff]  ;;  %v5518_v48 = vld [vmem:[#allocation24_spill] sm:$0xff] }
 0x206   : > { %v1813_v54 = vmul.f32 %v2863_v59, %v4437_v13  ;;  %v2097_v45 = vsel %vm2096_vm13, %v5501_v46, %v2093_v31  ;;  %v2139_v62 = vsub.f32 3.1415927, %v2137_v9  ;;  %v2176_v27 = vadd.f32 0.19993454, %v2175_v0  ;;  %v4998_v16 = vpop.f32.mrb[11].mxu0 }
 0x207   : > { %v2265_v29 = vmul.f32 %v2264_v19, %v4854_v15  ;;  %v2101_v8 = vsel %vm4580_vm6, nan, %v2097_v45  ;;  %v2230_v50 = vsub.f32 1.5707964, %v2228_v57  ;;  %vm1814_vm12 = vcmp.eq.f32.partialorder %v4437_v13, inf  ;;  %v5003_v19 = vpop.f32.mrb[10].mxu1 }
 0x208   : > { %vm1816_vm9 = vcmp.eq.f32.partialorder %v4437_v13, 0.0  ;;  %v2107_v59 = vsel %vm4606_vm7, %v5503_v14, %v2101_v8  ;;  %vm5506_vm3 = vcmp.lt.f32.partialorder %v5505_v2, 0.0  ;;  %v2177_v17 = vmul.f32 %v2176_v27, %v4824_v55  ;;  %v5031_v2 = vpop.permute.xlu0 %1904 }
 0x209   : > { %v2140_v10 = vsel %vm5506_vm3, %v2139_v62, %v2137_v9  ;;  %v2266_v61 = vadd.f32 0.1064488, %v2265_v29  ;;  %v2108_v6 = vand.u32 2147483647, %v2107_v59  ;;  %vm5510_vm6 = vcmp.gt.f32.partialorder %v5508_v52, %v5509_v26  ;;  %v5524_v62 = vld [vmem:[#allocation34_spill] sm:$0xff]  ;;  %v5526_v29 = vld [vmem:[#allocation63_spill] sm:$0xff] }
 0x20a   : > { %v2144_v32 = vsel %vm2143_vm5, %v5507_v20, %v2140_v10  ;;  %v2231_v49 = vsel %vm5510_vm6, %v2230_v50, %v2228_v57  ;;  %v1815_v43 = vsel %vm1814_vm12, %v4437_v13, %v1813_v54  ;;  %vm2185_vm13 = vcmp.lt.f32.partialorder %v5511_v51, 0.0  ;;  %v5523_v54 = vld [vmem:[#allocation61_spill] sm:$0xff]  ;;  %v5527_v59 = vld [vmem:[#allocation36_spill] sm:$0xff]  ;;  %v5528_v10 = vld [vmem:[#allocation22_spill] sm:$0xff] }
 0x20b   : > { %vm5513_vm7 = vnez %v5512_v33  ;;  %v2233_v24 = vsub.f32 3.1415927, %v2231_v49  ;;  %v2178_v42 = vadd.f32 -0.33333147, %v2177_v17  ;;  %v2267_v25 = vmul.f32 %v2266_v61, %v4854_v15  ;;  %v5530_v26 = vld [vmem:[#allocation62_spill] sm:$0xff] }
 0x20c   : > { %v2148_v18 = vsel %vm5513_vm7, nan, %v2144_v32  ;;  %v5514_v38 = vand.u32 2147483648, %v4559_v7  ;;  %vm5517_vm4 = vnez %v5516_v63  ;;  %v1817_v21 = vand.u32 2147483648, %v4437_v13  ;;  %v5543_v13 = vld [vmem:[#allocation57_spill] sm:$0xff] }
 0x20d   : > { %v2154_v41 = vsel %vm5517_vm4, %v5515_v40, %v2148_v18  ;;  %v1806_v56 = vmul.f32 %v2865_v28, %v4461_v53  ;;  %vm5519_vm5 = vcmp.lt.f32.partialorder %v5518_v48, 0.0  ;;  %v2179_v0 = vmul.f32 %v2178_v42, %v4824_v55  ;;  %v5012_v28 = vpop.f32.mrb[11].mxu1  ;;  %v5531_v18 = vld [vmem:[#allocation37_spill] sm:$0xff] }
 0x20e   : > { %v4991_v30 = vor.u32 %v5514_v38, %v2108_v6  ;;  %v2155_v36 = vand.u32 2147483647, %v2154_v41  ;;  %v2234_v3 = vsel %vm5519_vm5, %v2233_v24, %v2231_v49  ;;  %v2268_v7 = vadd.f32 -0.14207031, %v2267_v25  ;;  %v5533_v24 = vld [vmem:[#allocation38_spill] sm:$0xff] }
 0x20f   : > { %v2238_v31 = vsel %vm2237_vm10, %v5520_v60, %v2234_v3  ;;  %v1818_v34 = vsel %vm1816_vm9, %v1817_v21, %v1815_v43  ;;  %vm1807_vm1 = vcmp.eq.f32.partialorder %v4461_v53, inf  ;;  %vm1809_vm8 = vcmp.eq.f32.partialorder %v4461_v53, 0.0 }
 0x210   : > { %v5521_v37 = vand.u32 2147483648, %v4584_v44  ;;  %v2242_v57 = vsel %vm4675_vm0, nan, %v2238_v31  ;;  %v2180_v46 = vmul.f32 %v2179_v0, %v5523_v54  ;;  %v2269_v45 = vmul.f32 %v2268_v7, %v4854_v15  ;;  %v5538_v7 = vld [vmem:[#allocation52_spill] sm:$0xff]  ;;  %v5539_v31 = vld [vmem:[#allocation43_spill] sm:$0xff] }
 0x211   : > { %v2248_v27 = vsel %vm4687_vm14, %v5524_v62, %v2242_v57  ;;  %v1888_v12 = vadd.f32 %v1818_v34, %v5526_v29  ;;  %v1808_v8 = vsel %vm1807_vm1, %v4461_v53, %v1806_v56  ;;  %v1810_v50 = vand.u32 2147483648, %v4461_v53  ;;  %v5532_v53 = vld [vmem:[#allocation54_spill] sm:$0xff]  ;;  %v5075_v34 = vpop.permute.xlu0 %2301  ;;  %v5540_v57 = vld [vmem:[#allocation55_spill] sm:$0xff] }
 0x212   : > { %v5016_v55 = vor.u32 %v5521_v37, %v2155_v36  ;;  %v2249_v44 = vand.u32 2147483647, %v2248_v27  ;;  %v2181_v14 = vadd.f32 %v2180_v46, %v5523_v54  ;;  %v2270_v47 = vadd.f32 0.19993454, %v2269_v45  ;;  %v5542_v45 = vld [vmem:[#allocation53_spill] sm:$0xff] }
 0x213   : > { %2866 = vrsqrt.f32 %v5527_v59  ;;  %vm2188_vm0 = vcmp.lt.s32.totalorder %v5511_v51, 0  ;;  %vm2279_vm10 = vcmp.lt.f32.partialorder %v5528_v10, 0.0  ;;  %v1896_v17 = vmul.f32 0.5, %v1888_v12 }
 0x214   : > { %v1811_v61 = vsel %vm1809_vm8, %v1810_v50, %v1808_v8  ;;  %v5529_v6 = vand.u32 2147483648, %v5495_v22  ;;  %v2183_v32 = vsub.f32 1.5707964, %v2181_v14  ;;  %v2271_v52 = vmul.f32 %v2270_v47, %v4854_v15 }
 0x215   : > { %v1887_v49 = vadd.f32 %v1811_v61, %v5530_v26  ;;  %vm2282_vm14 = vcmp.lt.s32.totalorder %v5528_v10, 0  ;;  %v1907_v43 = vadd.f32 %v5031_v2, %v4953_v11  ;;  %v1909_v33 = vadd.f32 %v5031_v2, %v1896_v17  ;;  %v5537_v11 = vld [vmem:[#allocation41_spill] sm:$0xff] }
 0x216   : > { %v2251_v20 = vor.u32 %v5529_v6, %v2249_v44  ;;  %2868 = vrsqrt.f32 %v5531_v18  ;;  %vm5534_vm15 = vcmp.gt.f32.partialorder %v5532_v53, %v5533_v24  ;;  %v2272_v22 = vadd.f32 -0.33333147, %v2271_v52 }
 0x217   : > { %v2184_v42 = vsel %vm5534_vm15, %v2183_v32, %v2181_v14  ;;  %v1895_v25 = vmul.f32 0.5, %v1887_v49  ;;  %v5535_v38 = vmov 0.0   ;;  %v5536_v63 = vmov 0.7853982   ;;  %1915 = vst [vmem:[%s5055_s20] sm:$0xff] %v1907_v43  ;;  %1917 = vst [vmem:[%s5055_s20 + $0x10] sm:$0xff] %v1909_v33 }
 0x218   : > { %v2189_v40 = vsel %vm2188_vm0, 3.1415927, %v5535_v38  ;;  %v2197_v41 = vsel %vm2185_vm13, 2.3561945, %v5536_v63  ;;  %v2186_v21 = vsub.f32 3.1415927, %v2184_v42  ;;  %2870 = vrsqrt.f32 %v5537_v11 }
 0x219   : > { %v5061_v56 = vsel %vm2282_vm14, 3.1415927, %v5535_v38  ;;  %v5066_v36 = vsel %vm2279_vm10, 2.3561945, %v5536_v63  ;;  %v2273_v48 = vmul.f32 %v2272_v22, %v4854_v15  ;;  %v1908_v3 = vadd.f32 %v5031_v2, %v1895_v25 }
 0x21a   : > { %v2187_v0 = vsel %vm2185_vm13, %v2186_v21, %v2184_v42  ;;  %vm2190_vm12 = vcmp.eq.f32.partialorder %v5538_v7, 0.0  ;;  %v2203_v60 = vand.u32 2147483648, %v5538_v7  ;;  %2872 = vrsqrt.f32 %v5539_v31 }
 0x21b   : > { %v2191_v37 = vsel %vm2190_vm12, %v2189_v40, %v2187_v0  ;;  %v2274_v9 = vmul.f32 %v2273_v48, %v4842_v5  ;;  %v2297_v54 = vand.u32 2147483648, %v5540_v57  ;;  %vm1821_vm9 = vcmp.eq.f32.partialorder %v5527_v59, inf  ;;  %1916 = vst [vmem:[%s5055_s20 + $0x8] sm:$0xff] %v1908_v3 }
 0x21c   : > { %v2195_v51 = vsel %vm4729_vm2, nan, %v2191_v37  ;;  %vm2284_vm3 = vcmp.eq.f32.partialorder %v5540_v57, 0.0  ;;  %vm1823_vm6 = vcmp.eq.f32.partialorder %v5527_v59, 0.0  ;;  %v1824_v46 = vand.u32 2147483648, %v5527_v59 }
 0x21d   : > { %2874 = vrsqrt.f32 %v5542_v45  ;;  %v2867_v62 = vpop.eup %2866  ;;  %vm5544_vm13 = vnez %v5543_v13  ;;  %v2275_v29 = vadd.f32 %v2274_v9, %v4842_v5  ;;  %vm1828_vm7 = vcmp.eq.f32.partialorder %v5531_v18, inf }
 0x21e   : > { %v2201_v27 = vsel %vm5544_vm13, %v2197_v41, %v2195_v51  ;;  %v2304_v12 = vadd.f32 %v5075_v34, %v4924_v1  ;;  %v1820_v50 = vmul.f32 %v2867_v62, %v5527_v59  ;;  %v2305_v44 = vadd.f32 %v5075_v34, %v4948_v39 }
 0x21f   : > { %v2202_v8 = vand.u32 2147483647, %v2201_v27  ;;  %v2306_v14 = vadd.f32 %v5075_v34, %v4943_v35  ;;  %v2277_v47 = vsub.f32 1.5707964, %v2275_v29  ;;  %v2307_v17 = vadd.f32 %v5075_v34, %v4991_v30 }
 0x220   : > { %v2308_v5 = vadd.f32 %v5075_v34, %v5016_v55  ;;  %v2310_v61 = vadd.f32 %v5075_v34, %v2251_v20  ;;  %2312 = vst [vmem:[%s5105_s17] sm:$0xff] %v2304_v12  ;;  %v2869_v1 = vpop.eup %2868  ;;  %v1822_v39 = vsel %vm1821_vm9, %v5527_v59, %v1820_v50  ;;  %vm1830_vm2 = vcmp.eq.f32.partialorder %v5531_v18, 0.0  ;;  %2313 = vst [vmem:[%s5105_s17 + $0x8] sm:$0xff] %v2305_v44  ;;  %v5545_v55 = vld [vmem:[#allocation44_spill] sm:$0xff] }
 0x221   : > { %v2204_v35 = vor.u32 %v2203_v60, %v2202_v8  ;;  %v1831_v30 = vand.u32 2147483648, %v5531_v18  ;;  %2314 = vst [vmem:[%s5105_s17 + $0x10] sm:$0xff] %v2306_v14  ;;  %vm5546_vm4 = vcmp.gt.f32.partialorder %v4752_v4, %v5545_v55  ;;  %v1825_v20 = vsel %vm1823_vm6, %v1824_v46, %v1822_v39  ;;  %2315 = vst [vmem:[%s5105_s17 + $0x18] sm:$0xff] %v2307_v17 }
 0x222   : > { %v2278_v6 = vsel %vm5546_vm4, %v2277_v47, %v2275_v29  ;;  %v1827_v32 = vmul.f32 %v2869_v1, %v5531_v18  ;;  %vm1842_vm5 = vcmp.eq.f32.partialorder %v5537_v11, inf  ;;  %2316 = vst [vmem:[%s5105_s17 + $0x20] sm:$0xff] %v2308_v5  ;;  %2318 = vst [vmem:[%s5105_s17 + $0x30] sm:$0xff] %v2310_v61  ;;  %v2871_v52 = vpop.eup %2870  ;;  %v1889_v49 = vadd.f32 %v1825_v20, %v4844_v23 }
 0x223   : > { %v2280_v26 = vsub.f32 3.1415927, %v2278_v6  ;;  %vm1844_vm1 = vcmp.eq.f32.partialorder %v5537_v11, 0.0  ;;  %v2309_v4 = vadd.f32 %v5075_v34, %v2204_v35  ;;  %v1841_v43 = vmul.f32 %v2871_v52, %v5537_v11 }
 0x224   : > { %v1829_v59 = vsel %vm1828_vm7, %v5531_v18, %v1827_v32  ;;  %v1845_v33 = vand.u32 2147483648, %v5537_v11  ;;  %vm1835_vm8 = vcmp.eq.f32.partialorder %v5539_v31, inf  ;;  %v2873_v53 = vpop.eup %2872  ;;  %v1897_v42 = vmul.f32 0.5, %v1889_v49  ;;  %v5547_v18 = vld [vmem:[#allocation58_spill] sm:$0xff] }
 0x225   : > { %v2281_v24 = vsel %vm2279_vm10, %v2280_v26, %v2278_v6  ;;  %v1832_v23 = vsel %vm1830_vm2, %v1831_v30, %v1829_v59  ;;  %vm1837_vm0 = vcmp.eq.f32.partialorder %v5539_v31, 0.0  ;;  %2317 = vst [vmem:[%s5105_s17 + $0x28] sm:$0xff] %v2309_v4  ;;  %v1843_v38 = vsel %vm1842_vm5, %v5537_v11, %v1841_v43 }
 0x226   : > { %v2285_v22 = vsel %vm2284_vm3, %v5061_v56, %v2281_v24  ;;  %v1890_v25 = vadd.f32 %v1832_v23, %v4987_v58  ;;  %v1834_v10 = vmul.f32 %v2873_v53, %v5539_v31  ;;  %vm5548_vm10 = vnez %v5547_v18 }
 0x227   : > { %v2875_v40 = vpop.eup %2874  ;;  %v2289_v63 = vsel %vm5548_vm10, nan, %v2285_v22  ;;  %v1910_v41 = vadd.f32 %v5031_v2, %v1897_v42  ;;  %v1846_v21 = vsel %vm1844_vm1, %v1845_v33, %v1843_v38  ;;  %v1838_v56 = vand.u32 2147483648, %v5539_v31 }
 0x228   : > { %v2295_v48 = vsel %vm4806_vm11, %v5066_v36, %v2289_v63  ;;  %v1898_v3 = vmul.f32 0.5, %v1890_v25  ;;  %v1892_v0 = vadd.f32 %v1846_v21, %v5003_v19  ;;  %v1836_v7 = vsel %vm1835_vm8, %v5539_v31, %v1834_v10 }
 0x229   : > { %v2296_v60 = vand.u32 2147483647, %v2295_v48  ;;  %1918 = vst [vmem:[%s5055_s20 + $0x18] sm:$0xff] %v1910_v41  ;;  %v1839_v11 = vsel %vm1837_vm0, %v1838_v56, %v1836_v7  ;;  %v1848_v37 = vmul.f32 %v2875_v40, %v5542_v45  ;;  %vm1849_vm14 = vcmp.eq.f32.partialorder %v5542_v45, inf }
 0x22a   : > { %v1911_v36 = vadd.f32 %v5031_v2, %v1898_v3  ;;  %v1900_v19 = vmul.f32 0.5, %v1892_v0  ;;  %v1891_v9 = vadd.f32 %v1839_v11, %v4998_v16  ;;  %v1852_v15 = vand.u32 2147483648, %v5542_v45 }
 0x22b   : > { %v2298_v31 = vor.u32 %v2297_v54, %v2296_v60  ;;  %v1850_v51 = vsel %vm1849_vm14, %v5542_v45, %v1848_v37  ;;  %vm1851_vm11 = vcmp.eq.f32.partialorder %v5542_v45, 0.0 }
 0x22c   : > { %1919 = vst [vmem:[%s5055_s20 + $0x20] sm:$0xff] %v1911_v36  ;;  %v1913_v46 = vadd.f32 %v5031_v2, %v1900_v19  ;;  %v1899_v62 = vmul.f32 0.5, %v1891_v9  ;;  %v1853_v16 = vsel %vm1851_vm11, %v1852_v15, %v1850_v51 }
 0x22d   : > { %v1893_v57 = vadd.f32 %v1853_v16, %v5012_v28  ;;  %v2311_v54 = vadd.f32 %v5075_v34, %v2298_v31 }
 0x22e   : > { %1921 = vst [vmem:[%s5055_s20 + $0x30] sm:$0xff] %v1913_v46  ;;  %v1912_v45 = vadd.f32 %v5031_v2, %v1899_v62 }
 0x22f   : > { %v1901_v13 = vmul.f32 0.5, %v1893_v57  ;;  %2319 = vst [vmem:[%s5105_s17 + $0x38] sm:$0xff] %v2311_v54 }
 0x230   : > { %1920 = vst [vmem:[%s5055_s20 + $0x28] sm:$0xff] %v1912_v45 }
 0x231   : > { %3034 = shalt.err (!%p3031_p5)
}
 0x232   : > { %s3035_s16 = scalar_lea.hbm %s5182_s19, 1024  ;;  %s3039_s15 = scalar_lea.hbm %s5274_s6, 2048 }
 0x233   : > { %p3036_p1 = scmp.ne.s32.totalorder %s5182_s19, %s3035_s16  ;;  %p3040_p10 = scmp.lt.u32.totalorder %s5182_s19, %s5274_s6 }
 0x234   : > { %p3041_p2 = scmp.lt.u32.totalorder %s3039_s15, %s3035_s16  ;;  %p3043_p7 = scmp.lt.u32.totalorder %s3035_s16, %s5182_s19 }
 0x235   : > { %p3037_p3 = pnand %p3036_p1, %p5550_p8 }
 0x236   : > { %p3042_p0 = por %p3041_p2, %p3040_p10 }
 0x237   : > { %p3038_p9 = pneg %p3037_p3 }
 0x238   : > { %p3044_p11 = por %p3043_p7, %p3042_p0 }
 0x23a   : > { %p3045_p12 = pnand %p3044_p11, %p3038_p9 }
 0x23c   : > { %3048 = shalt.err (!%p3045_p12)
}
 0x23d   : > { %2687 = dma.vmem_to_hbm [thread:$0]  (%p5550_p8), %s5186_s26, 1024, %s5182_s19, %s2326_s28   ;;  %v1914_v28 = vadd.f32 %v5031_v2, %v1901_v13 }
 0x23e   : > { %s5221_s7 = scalar_lea.hbm %s5273_s5, %s2569_s18  ;;  %s2321_s14 = scalar_lea.sflag [#allocation4], %s3416_s3 }
 0x23f   : > { %1922 = vst [vmem:[%s5055_s20 + $0x38] sm:$0xff] %v1914_v28  ;;  %s3049_s12 = scalar_lea.vmem %s5225_s2, 1024  ;;  %s3145_s26 = smov [#allocation11]  }
 0x240   : > { %p3050_p6 = scmp.ne.s32.totalorder %s5225_s2, %s3049_s12  ;;  %s3053_s25 = sshll.u32 %s3145_s26, 4  ;;  %s3054_s25 = int_to_ptr.vmem [resolvable:$false] %s3053_s25 }
 0x241   : > { %s3055_s19 = scalar_lea.vmem %s3054_s25, 2048  ;;  %p3056_p5 = scmp.lt.s32.totalorder %s5225_s2, %s3054_s25 }
 0x242   : > { %p3051_p13 = pnand %p3050_p6, %p5550_p8  ;;  %p3057_p1 = scmp.lt.s32.totalorder %s3055_s19, %s3049_s12 }
 0x244   : > { %p3052_p4 = pneg %p3051_p13  ;;  %p3058_p3 = por %p3057_p1, %p3056_p5 }
 0x246   : > { %p3059_p9 = pnand %p3058_p3, %p3052_p4 }
 0x248   : > { %3062 = shalt.err (!%p3059_p9)
}
 0x249   : > { %s3063_s3 = scalar_lea.hbm %s5221_s7, 1024  ;;  %s3067_s28 = scalar_lea.hbm %s5273_s5, 2048 }
 0x24a   : > { %p3064_p10 = scmp.ne.s32.totalorder %s5221_s7, %s3063_s3  ;;  %p3068_p7 = scmp.lt.u32.totalorder %s5221_s7, %s5273_s5 }
 0x24b   : > { %p3069_p11 = scmp.lt.u32.totalorder %s3067_s28, %s3063_s3  ;;  %p3071_p6 = scmp.lt.u32.totalorder %s3063_s3, %s5221_s7 }
 0x24c   : > { %p3065_p2 = pnand %p3064_p10, %p5550_p8 }
 0x24d   : > { %p3070_p12 = por %p3069_p11, %p3068_p7 }
 0x24e   : > { %p3066_p0 = pneg %p3065_p2 }
 0x24f   : > { %p3072_p13 = por %p3071_p6, %p3070_p12 }
 0x251   : > { %p3073_p4 = pnand %p3072_p13, %p3066_p0 }
 0x253   : > { %3076 = shalt.err (!%p3073_p4)
}
 0x254   : > { %2686 = dma.vmem_to_hbm [thread:$0]  (%p5550_p8), %s5225_s2, 1024, %s5221_s7, %s2321_s14  }
 0x255 PF: > { %s2366_s0 = sand.u32 1, %s3119_s21   ;;  %p5551_p5 = scmp.ne.s32.totalorder %s5346_s10, 0 }
 0x256   : > { %p5552_p1 = scmp.ge.s32.totalorder %s3131_s24, 2  ;;  %s2367_s11 = scalar_lea.sflag [#allocation4], %s2366_s0 }
 0x258   : > { %p2708_p3 = pnand %p5552_p1, %p5551_p5 }
 0x25a   : > { %3110 = dma.done.wait (!%p2708_p3), %s2367_s11, 1024  }
 0x25b   : > { %3112 = vsyncadd (!%p2708_p3), %s2367_s11, 4294966272  ;;  %s2376_s15 = scalar_lea.sflag [#allocation13], %s2366_s0 }
 0x25c   : > { %3114 = dma.done.wait (!%p2708_p3), %s2376_s15, 1024  }
 0x25d   : > { %3116 = vsyncadd (!%p2708_p3), %s2376_s15, 4294966272  ;;  %s5553_s9 = sld [smem:[#allocation20_spill]]  ;;  %p27_p8 = scmp.ge.s32.totalorder %s3206_s27, 4  }
 0x25e   : > { %s5554_s21 = smov %s3123_s22  ;;  %s5555_s22 = smov %s3127_s23 }
 0x25f   : > { %s5557_s24 = smov %s3206_s27  ;;  %29 = sbr.rel (!%p27_p8) target bundleno = 14 (0xe), region = 127 }
 0x263   : > { %s5556_s23 = smov %s5553_s9 }
 0x266   :  { %2381 = vsyncpa [#allocation3], 1 }
 0x267   :  { %2383 = vsyncpa [#allocation3 + $0x1], 1 }
 0x268   :  { %2384 = vsyncpa [#allocation6], 1 }
 0x269   :  { %2386 = vsyncpa [#allocation6 + $0x1], 1 }
 0x26a   :  { %2387 = vsyncpa [#allocation9], 1 }
 0x26b   :  { %2388 = vsyncpa [#allocation4], 1 }
 0x26c   :  { %2390 = vsyncpa [#allocation4 + $0x1], 1 }
 0x26d   :  { %2391 = vsyncpa [#allocation13], 1 }
 0x26e   :  { %2393 = vsyncpa [#allocation13 + $0x1], 1 }

</bundles_post_ra>
